<compile_context>
chip_gen: v7x
topology: tpu7x:2x2x1
jax: 0.10.0
libtpu: 0.0.40
codegen_flags: <defaults>
</compile_context>

<pallas_src>
import jax
import jax.numpy as jnp
from jax.experimental import pallas as pl
from jax.experimental.pallas import tpu as pltpu


HIDDEN = 512
BN_EPS = 1e-5
HEAD_LANES = 128          # lane-dense fused output slab: [logits | value | 0-pad]
MAX_BLOCK_B = 512         # batch-tile cap (rows); keeps VMEM footprint < ~8 MiB


def _round_up(x, m):
    return ((x + m - 1) // m) * m


# ----------------------------------------------------------------------------- kernel
def _policy_kernel(x_ref,
                   w1_ref, b1_ref,        # obs_layer1 (+ folded obs_bn1)
                   w2_ref, b2_ref,        # obs_layer2 (+ folded obs_bn2)
                   wh1_ref, bh1_ref,      # fused [act1|val1] (+ folded BNs)
                   wh2_ref, bh2_ref,      # fused block-diag [act2|val2], 128 lanes
                   out_ref):
    # Activations stay f32; only MXU operands are bf16, accumulate in f32.
    x = x_ref[...].astype(jnp.bfloat16)

    h1 = jnp.dot(x, w1_ref[...], preferred_element_type=jnp.float32) + b1_ref[...]
    h1 = jnp.tanh(h1)

    h2 = jnp.dot(h1.astype(jnp.bfloat16), w2_ref[...],
                 preferred_element_type=jnp.float32) + b2_ref[...]
    h2 = jnp.tanh(h2)

    hh = jnp.dot(h2.astype(jnp.bfloat16), wh1_ref[...],
                 preferred_element_type=jnp.float32) + bh1_ref[...]
    hh = jnp.tanh(hh)

    out_ref[...] = jnp.dot(hh.astype(jnp.bfloat16), wh2_ref[...],
                           preferred_element_type=jnp.float32) + bh2_ref[...]


# ----------------------------------------------------------------------------- params
def init_params(key, obs_dim, action_dim, hidden=HIDDEN, dtype=jnp.float32):
    """Mirror the module's __init__: weights ~ randn * 1/sqrt(fan_in),
    biases ~ U(-1/sqrt(fan_in), 1/sqrt(fan_in)), BatchNorm at fresh defaults."""
    dims = [
        ("obs1", obs_dim, hidden), ("obs2", hidden, hidden),
        ("act1", hidden, hidden), ("act2", hidden, action_dim),
        ("val1", hidden, hidden), ("val2", hidden, 1),
    ]
    params = {}
    for name, fan_in, fan_out in dims:
        key, kw, kb = jax.random.split(key, 3)
        scale = 1.0 / jnp.sqrt(jnp.asarray(fan_in, dtype))
        params[f"{name}_w"] = jax.random.normal(kw, (fan_in, fan_out), dtype) * scale
        params[f"{name}_b"] = jax.random.uniform(
            kb, (1, fan_out), dtype, minval=-scale, maxval=scale)
    for bn in ["bn1", "bn2", "bna", "bnv"]:
        params[f"{bn}_gamma"] = jnp.ones((hidden,), dtype)
        params[f"{bn}_beta"] = jnp.zeros((hidden,), dtype)
        params[f"{bn}_mean"] = jnp.zeros((hidden,), dtype)
        params[f"{bn}_var"] = jnp.ones((hidden,), dtype)
    return params


def _fold_bn_into_linear(w, b, gamma, beta, mean, var, eps=BN_EPS):
    """y = BN(x@W + b) == x@(W*scale) + (b*scale + shift), eval-mode BN."""
    scale = gamma / jnp.sqrt(var + eps)
    shift = beta - mean * scale
    return w * scale[None, :], b * scale[None, :] + shift[None, :]


def prepare_params(params, hidden=HIDDEN):
    """One-time prep: fold BN into Linear, fuse actor/value heads, cast weights
    to bf16 (biases stay f32 and are added post-matmul in f32)."""
    w1, b1 = _fold_bn_into_linear(params["obs1_w"], params["obs1_b"],
                                  params["bn1_gamma"], params["bn1_beta"],
                                  params["bn1_mean"], params["bn1_var"])
    w2, b2 = _fold_bn_into_linear(params["obs2_w"], params["obs2_b"],
                                  params["bn2_gamma"], params["bn2_beta"],
                                  params["bn2_mean"], params["bn2_var"])
    wa1, ba1 = _fold_bn_into_linear(params["act1_w"], params["act1_b"],
                                    params["bna_gamma"], params["bna_beta"],
                                    params["bna_mean"], params["bna_var"])
    wv1, bv1 = _fold_bn_into_linear(params["val1_w"], params["val1_b"],
                                    params["bnv_gamma"], params["bnv_beta"],
                                    params["bnv_mean"], params["bnv_var"])

    # fused head layer 1: one (512, 1024) matmul from h2
    wh1 = jnp.concatenate([wa1, wv1], axis=1)            # (H, 2H)
    bh1 = jnp.concatenate([ba1, bv1], axis=1)            # (1, 2H)

    # fused head layer 2: block-diagonal (2H, 128); lanes [0:A] = logits, [A] = value
    A = params["act2_w"].shape[1]
    assert A + 1 <= HEAD_LANES, "action_dim must fit in one 128-lane slab"
    wh2 = jnp.zeros((2 * hidden, HEAD_LANES), jnp.float32)
    wh2 = wh2.at[:hidden, :A].set(params["act2_w"])
    wh2 = wh2.at[hidden:, A].set(params["val2_w"][:, 0])
    bh2 = jnp.zeros((1, HEAD_LANES), jnp.float32)
    bh2 = bh2.at[0, :A].set(params["act2_b"][0])
    bh2 = bh2.at[0, A].set(params["val2_b"][0, 0])

    return {
        "w1": w1.astype(jnp.bfloat16), "b1": b1.astype(jnp.float32),
        "w2": w2.astype(jnp.bfloat16), "b2": b2.astype(jnp.float32),
        "wh1": wh1.astype(jnp.bfloat16), "bh1": bh1.astype(jnp.float32),
        "wh2": wh2.astype(jnp.bfloat16), "bh2": bh2.astype(jnp.float32),
        "action_dim": A,
    }


# ----------------------------------------------------------------------------- wrapper
def policy_forward(state, prepped):
    """Fused Policy forward pass as a single Pallas TPU kernel.
    Returns (action_logits [B, A], state_value [B, 1])."""
    if state.ndim == 1:
        state = state[None, :]
    state = state.astype(jnp.float32)
    B, obs_dim = state.shape
    A = prepped["action_dim"]
    H = prepped["w1"].shape[1]

    # sublane-aligned batch tile; weights stay VMEM-resident across grid steps
    block_b = min(MAX_BLOCK_B, _round_up(B, 8))
    B_pad = _round_up(B, block_b)
    if B_pad != B:
        state = jnp.pad(state, ((0, B_pad - B), (0, 0)))
    nb = B_pad // block_b

    const = lambda i: (0, 0)          # weights: same block every grid step
    grid_spec = pltpu.PrefetchScalarGridSpec(
        num_scalar_prefetch=0,
        grid=(nb,),
        in_specs=[
            pl.BlockSpec((block_b, obs_dim), lambda i: (i, 0)),
            pl.BlockSpec(prepped["w1"].shape, const),
            pl.BlockSpec(prepped["b1"].shape, const),
            pl.BlockSpec(prepped["w2"].shape, const),
            pl.BlockSpec(prepped["b2"].shape, const),
            pl.BlockSpec(prepped["wh1"].shape, const),
            pl.BlockSpec(prepped["bh1"].shape, const),
            pl.BlockSpec(prepped["wh2"].shape, const),
            pl.BlockSpec(prepped["bh2"].shape, const),
        ],
        out_specs=pl.BlockSpec((block_b, HEAD_LANES), lambda i: (i, 0)),
    )

    # Advisory cost hint for XLA's scheduler around the custom call.
    flops = 2 * B_pad * (obs_dim * H + H * H + H * 2 * H + 2 * H * HEAD_LANES)
    trans = B_pad * (H + H + 2 * H)                       # tanh count
    w_bytes = sum(int(prepped[k].size) * prepped[k].dtype.itemsize
                  for k in ("w1", "b1", "w2", "b2", "wh1", "bh1", "wh2", "bh2"))
    bytes_accessed = w_bytes + state.size * 4 + B_pad * HEAD_LANES * 4

    out = pl.pallas_call(
        _policy_kernel,
        out_shape=jax.ShapeDtypeStruct((B_pad, HEAD_LANES), jnp.float32),
        grid_spec=grid_spec,
        compiler_params=pltpu.CompilerParams(
            dimension_semantics=("parallel",)),   # shards across v7x's 2 TCs
        cost_estimate=pl.CostEstimate(flops=flops, transcendentals=trans,
                                      bytes_accessed=bytes_accessed),
    )(state, prepped["w1"], prepped["b1"], prepped["w2"], prepped["b2"],
      prepped["wh1"], prepped["bh1"], prepped["wh2"], prepped["bh2"])

    logits = out[:B, :A]
    value = out[:B, A:A + 1]
    return logits, value


def policy_forward_ref(state, params):
    """Pure-JAX f32 reference of the original module semantics (eval-mode BN),
    without folding / fusion / bf16 — used as the correctness oracle."""
    if state.ndim == 1:
        state = state[None, :]
    state = state.astype(jnp.float32)

    def bn(x, pfx):
        scale = params[f"{pfx}_gamma"] / jnp.sqrt(params[f"{pfx}_var"] + BN_EPS)
        shift = params[f"{pfx}_beta"] - params[f"{pfx}_mean"] * scale
        return x * scale[None, :] + shift[None, :]

    h1 = jnp.tanh(bn(state @ params["obs1_w"] + params["obs1_b"], "bn1"))
    h2 = jnp.tanh(bn(h1 @ params["obs2_w"] + params["obs2_b"], "bn2"))
    a1 = jnp.tanh(bn(h2 @ params["act1_w"] + params["act1_b"], "bna"))
    logits = a1 @ params["act2_w"] + params["act2_b"]
    v1 = jnp.tanh(bn(h2 @ params["val1_w"] + params["val1_b"], "bnv"))
    value = v1 @ params["val2_w"] + params["val2_b"]
    return logits, value


# ----------------------------------------------------------------------------- demo
if __name__ == "__main__":
    key = jax.random.PRNGKey(0)
    k_param, k_state = jax.random.split(key)

    batch = 2
    obs_dim = 8       # e.g. LunarLander-v2 observation dim
    action_dim = 4    # e.g. LunarLander-v2 discrete action dim

    params = init_params(k_param, obs_dim, action_dim)
    prepped = prepare_params(params)
    state = jax.random.normal(k_state, (batch, obs_dim), jnp.float32)

    logits, value = policy_forward(state, prepped)
    jax.block_until_ready((logits, value))

    ref_logits, ref_value = policy_forward_ref(state, params)
    assert logits.shape == (batch, action_dim) and value.shape == (batch, 1)
    # bf16 weight quantization vs f32 reference -> loose-but-meaningful tolerance
    assert jnp.allclose(logits, ref_logits, atol=5e-2, rtol=5e-2)
    assert jnp.allclose(value, ref_value, atol=5e-2, rtol=5e-2)

    # also exercise the 1-D (single-state, select_action-style) path
    s1 = state[0]
    l1, v1 = policy_forward(s1, prepped)
    jax.block_until_ready((l1, v1))
    assert l1.shape == (1, action_dim) and v1.shape == (1, 1)
    assert jnp.allclose(l1[0], ref_logits[0], atol=5e-2, rtol=5e-2)
    assert jnp.allclose(v1[0], ref_value[0], atol=5e-2, rtol=5e-2)

    print("KERNEL_OK")
</pallas_src>

<mosaic_0001>
module attributes {stable_mosaic.version = 11 : i64} {
  func.func @_policy_kernel(%arg0: i32, %arg1: memref<8x8xf32, #tpu.memory_space<vmem>>, %arg2: memref<8x512xbf16, #tpu.memory_space<vmem>>, %arg3: memref<1x512xf32, #tpu.memory_space<vmem>>, %arg4: memref<512x512xbf16, #tpu.memory_space<vmem>>, %arg5: memref<1x512xf32, #tpu.memory_space<vmem>>, %arg6: memref<512x1024xbf16, #tpu.memory_space<vmem>>, %arg7: memref<1x1024xf32, #tpu.memory_space<vmem>>, %arg8: memref<1024x128xbf16, #tpu.memory_space<vmem>>, %arg9: memref<1x128xf32, #tpu.memory_space<vmem>>, %arg10: memref<8x128xf32, #tpu.memory_space<vmem>>) attributes {dimension_semantics = [#tpu.dimension_semantics<parallel>], iteration_bounds = array<i64: 1>, scalar_prefetch = 0 : i64, scratch_operands = 0 : i64, tpu.core_type = #tpu.core_type<tc>, window_params = [{transform_indices = @transform_0, window_bounds = array<i64: 8, 8>}, {pipeline_mode = #tpu.pipeline_mode<synchronous>, transform_indices = @transform_1, window_bounds = array<i64: 8, 512>}, {pipeline_mode = #tpu.pipeline_mode<synchronous>, transform_indices = @transform_2, window_bounds = array<i64: 1, 512>}, {pipeline_mode = #tpu.pipeline_mode<synchronous>, transform_indices = @transform_3, window_bounds = array<i64: 512, 512>}, {pipeline_mode = #tpu.pipeline_mode<synchronous>, transform_indices = @transform_4, window_bounds = array<i64: 1, 512>}, {pipeline_mode = #tpu.pipeline_mode<synchronous>, transform_indices = @transform_5, window_bounds = array<i64: 512, 1024>}, {pipeline_mode = #tpu.pipeline_mode<synchronous>, transform_indices = @transform_6, window_bounds = array<i64: 1, 1024>}, {pipeline_mode = #tpu.pipeline_mode<synchronous>, transform_indices = @transform_7, window_bounds = array<i64: 1024, 128>}, {pipeline_mode = #tpu.pipeline_mode<synchronous>, transform_indices = @transform_8, window_bounds = array<i64: 1, 128>}, {transform_indices = @transform_9, window_bounds = array<i64: 8, 128>}]} {
    %c0 = arith.constant 0 : index
    %c0_0 = arith.constant 0 : index
    %0 = vector.load %arg1[%c0, %c0_0] : memref<8x8xf32, #tpu.memory_space<vmem>>, vector<8x8xf32>
    %1 = arith.truncf %0 : vector<8x8xf32> to vector<8x8xbf16>
    %c0_1 = arith.constant 0 : index
    %c0_2 = arith.constant 0 : index
    %2 = vector.load %arg2[%c0_1, %c0_2] : memref<8x512xbf16, #tpu.memory_space<vmem>>, vector<8x512xbf16>
    %cst = arith.constant dense<0.000000e+00> : vector<8x512xf32>
    %3 = tpu.matmul %1, %2, %cst {dimension_numbers = #tpu.dot_dimension_numbers<[1], [0], [0], [1], [0, 0, 1, 1], [], []>} : vector<8x8xbf16>, vector<8x512xbf16>, vector<8x512xf32> -> vector<8x512xf32>
    %c0_3 = arith.constant 0 : index
    %c0_4 = arith.constant 0 : index
    %4 = vector.load %arg3[%c0_3, %c0_4] : memref<1x512xf32, #tpu.memory_space<vmem>>, vector<1x512xf32>
    %5 = vector.broadcast %4 : vector<1x512xf32> to vector<8x512xf32>
    %6 = arith.addf %3, %5 : vector<8x512xf32>
    %7 = math.tanh %6 : vector<8x512xf32>
    %8 = arith.truncf %7 : vector<8x512xf32> to vector<8x512xbf16>
    %c0_5 = arith.constant 0 : index
    %c0_6 = arith.constant 0 : index
    %9 = vector.load %arg4[%c0_5, %c0_6] : memref<512x512xbf16, #tpu.memory_space<vmem>>, vector<512x512xbf16>
    %cst_7 = arith.constant dense<0.000000e+00> : vector<8x512xf32>
    %10 = tpu.matmul %8, %9, %cst_7 {dimension_numbers = #tpu.dot_dimension_numbers<[1], [0], [0], [1], [0, 0, 1, 1], [], []>} : vector<8x512xbf16>, vector<512x512xbf16>, vector<8x512xf32> -> vector<8x512xf32>
    %c0_8 = arith.constant 0 : index
    %c0_9 = arith.constant 0 : index
    %11 = vector.load %arg5[%c0_8, %c0_9] : memref<1x512xf32, #tpu.memory_space<vmem>>, vector<1x512xf32>
    %12 = vector.broadcast %11 : vector<1x512xf32> to vector<8x512xf32>
    %13 = arith.addf %10, %12 : vector<8x512xf32>
    %14 = math.tanh %13 : vector<8x512xf32>
    %15 = arith.truncf %14 : vector<8x512xf32> to vector<8x512xbf16>
    %c0_10 = arith.constant 0 : index
    %c0_11 = arith.constant 0 : index
    %16 = vector.load %arg6[%c0_10, %c0_11] : memref<512x1024xbf16, #tpu.memory_space<vmem>>, vector<512x1024xbf16>
    %cst_12 = arith.constant dense<0.000000e+00> : vector<8x1024xf32>
    %17 = tpu.matmul %15, %16, %cst_12 {dimension_numbers = #tpu.dot_dimension_numbers<[1], [0], [0], [1], [0, 0, 1, 1], [], []>} : vector<8x512xbf16>, vector<512x1024xbf16>, vector<8x1024xf32> -> vector<8x1024xf32>
    %c0_13 = arith.constant 0 : index
    %c0_14 = arith.constant 0 : index
    %18 = vector.load %arg7[%c0_13, %c0_14] : memref<1x1024xf32, #tpu.memory_space<vmem>>, vector<1x1024xf32>
    %19 = vector.broadcast %18 : vector<1x1024xf32> to vector<8x1024xf32>
    %20 = arith.addf %17, %19 : vector<8x1024xf32>
    %21 = math.tanh %20 : vector<8x1024xf32>
    %22 = arith.truncf %21 : vector<8x1024xf32> to vector<8x1024xbf16>
    %c0_15 = arith.constant 0 : index
    %c0_16 = arith.constant 0 : index
    %23 = vector.load %arg8[%c0_15, %c0_16] : memref<1024x128xbf16, #tpu.memory_space<vmem>>, vector<1024x128xbf16>
    %cst_17 = arith.constant dense<0.000000e+00> : vector<8x128xf32>
    %24 = tpu.matmul %22, %23, %cst_17 {dimension_numbers = #tpu.dot_dimension_numbers<[1], [0], [0], [1], [0, 0, 1, 1], [], []>} : vector<8x1024xbf16>, vector<1024x128xbf16>, vector<8x128xf32> -> vector<8x128xf32>
    %c0_18 = arith.constant 0 : index
    %c0_19 = arith.constant 0 : index
    %25 = vector.load %arg9[%c0_18, %c0_19] : memref<1x128xf32, #tpu.memory_space<vmem>>, vector<1x128xf32>
    %26 = vector.broadcast %25 : vector<1x128xf32> to vector<8x128xf32>
    %27 = arith.addf %24, %26 : vector<8x128xf32>
    %c0_20 = arith.constant 0 : index
    %c0_21 = arith.constant 0 : index
    %28 = vector.load %arg10[%c0_20, %c0_21] : memref<8x128xf32, #tpu.memory_space<vmem>>, vector<8x128xf32>
    tpu.vector_store %arg10[%c0_20, %c0_21], %27 {strides = array<i32>} : memref<8x128xf32, #tpu.memory_space<vmem>>, vector<8x128xf32>,
    return
  }
  func.func @transform_0(%arg0: i32) -> (i32, i32) {
    %c0_i32 = arith.constant 0 : i32
    %c0_i32_0 = arith.constant 0 : i32
    return %arg0, %c0_i32 : i32, i32
  }
  func.func @transform_1(%arg0: i32) -> (i32, i32) {
    %c0_i32 = arith.constant 0 : i32
    %c0_i32_0 = arith.constant 0 : i32
    %c0_i32_1 = arith.constant 0 : i32
    return %c0_i32, %c0_i32_0 : i32, i32
  }
  func.func @transform_2(%arg0: i32) -> (i32, i32) {
    %c0_i32 = arith.constant 0 : i32
    %c0_i32_0 = arith.constant 0 : i32
    %c0_i32_1 = arith.constant 0 : i32
    return %c0_i32, %c0_i32_0 : i32, i32
  }
  func.func @transform_3(%arg0: i32) -> (i32, i32) {
    %c0_i32 = arith.constant 0 : i32
    %c0_i32_0 = arith.constant 0 : i32
    %c0_i32_1 = arith.constant 0 : i32
    return %c0_i32, %c0_i32_0 : i32, i32
  }
  func.func @transform_4(%arg0: i32) -> (i32, i32) {
    %c0_i32 = arith.constant 0 : i32
    %c0_i32_0 = arith.constant 0 : i32
    %c0_i32_1 = arith.constant 0 : i32
    return %c0_i32, %c0_i32_0 : i32, i32
  }
  func.func @transform_5(%arg0: i32) -> (i32, i32) {
    %c0_i32 = arith.constant 0 : i32
    %c0_i32_0 = arith.constant 0 : i32
    %c0_i32_1 = arith.constant 0 : i32
    return %c0_i32, %c0_i32_0 : i32, i32
  }
  func.func @transform_6(%arg0: i32) -> (i32, i32) {
    %c0_i32 = arith.constant 0 : i32
    %c0_i32_0 = arith.constant 0 : i32
    %c0_i32_1 = arith.constant 0 : i32
    return %c0_i32, %c0_i32_0 : i32, i32
  }
  func.func @transform_7(%arg0: i32) -> (i32, i32) {
    %c0_i32 = arith.constant 0 : i32
    %c0_i32_0 = arith.constant 0 : i32
    %c0_i32_1 = arith.constant 0 : i32
    return %c0_i32, %c0_i32_0 : i32, i32
  }
  func.func @transform_8(%arg0: i32) -> (i32, i32) {
    %c0_i32 = arith.constant 0 : i32
    %c0_i32_0 = arith.constant 0 : i32
    %c0_i32_1 = arith.constant 0 : i32
    return %c0_i32, %c0_i32_0 : i32, i32
  }
  func.func @transform_9(%arg0: i32) -> (i32, i32) {
    %c0_i32 = arith.constant 0 : i32
    %c0_i32_0 = arith.constant 0 : i32
    return %arg0, %c0_i32 : i32, i32
  }
}

</mosaic_0001>

<bundles_post_ra>
// kernel: tpu_custom_call.1
= control target key start
LH: loop header
LB: loop body
LE: loop exit
PB: predicated region body
PF: predicated region fallthrough
CT: control target
= control target key end

     0   :  { %14 = vsyncpa [#allocation3], 0  ;;  %s5132_s0 = inlined_call_operand.hbm [shape: f32[8,8], index: 0, kind: input, shape index: {}]   ;;  %s5133_s1 = inlined_call_operand.hbm [shape: bf16[8,512], index: 1, kind: input, shape index: {}]   ;;  %s5134_s2 = inlined_call_operand.vmem [shape: f32[1,512], index: 2, kind: input, shape index: {}]   ;;  %s5135_s3 = inlined_call_operand.hbm [shape: bf16[512,512], index: 3, kind: input, shape index: {}]   ;;  %s5136_s4 = inlined_call_operand.hbm [shape: f32[1,512], index: 4, kind: input, shape index: {}]   ;;  %s5137_s5 = inlined_call_operand.hbm [shape: bf16[512,1024], index: 5, kind: input, shape index: {}]   ;;  %s5138_s6 = inlined_call_operand.vmem [shape: f32[1,1024], index: 6, kind: input, shape index: {}]   ;;  %s5139_s7 = inlined_call_operand.hbm [shape: bf16[1024,128], index: 7, kind: input, shape index: {}]   ;;  %s5140_s8 = inlined_call_operand.vmem [shape: f32[1,128], index: 8, kind: input, shape index: {}]   ;;  %s5141_s9 = inlined_call_operand.hbm [shape: f32[8,128], index: 9, kind: output, shape index: {}]  }
   0x1   :  { %15 = vsyncpa [#allocation6], 0 }
   0x2   :  { %16 = vsyncpa [#allocation9], 0 }
   0x3   :  { %17 = vsyncpa [#allocation12], 0 }
   0x4   :  { %18 = vsyncpa [#allocation4], 0  ;;  %s4886_s30 = smov [#allocation5]   ;;  %s4887_s11 = smov [#allocation8]  }
   0x5   :  { %s35_s10 = sshll.u32 %s4886_s30, 4  ;;  %s59_s12 = sshll.u32 %s4887_s11, 4  ;;  %s36_s10 = int_to_ptr.vmem [resolvable:$true] %s35_s10  ;;  %s60_s12 = int_to_ptr.vmem [resolvable:$true] %s59_s12 }
   0x6   :  { %s4722_s15 = scalar_lea.hbm %s5133_s1, 256 }
   0x7   :  { %p4723_p0 = scmp.ne.s32.totalorder %s5133_s1, %s4722_s15  ;;  %p4726_p1 = scmp.lt.u32.totalorder %s4722_s15, %s5133_s1 }
   0x9   :  { %p4728_p2 = pnand %p4726_p1, %p4723_p0 }
   0xb   :  { %4731 = shalt.err (!%p4728_p2)
}
   0xc   :  { %s4732_s20 = scalar_lea.vmem %s36_s10, 256  ;;  %p4737_p4 = scmp.lt.s32.totalorder %s36_s10, %s36_s10 }
   0xd   :  { %p4733_p3 = scmp.ne.s32.totalorder %s36_s10, %s4732_s20  ;;  %p4738_p5 = scmp.lt.s32.totalorder %s4732_s20, %s4732_s20 }
   0xf   :  { %p4739_p6 = por %p4738_p5, %p4737_p4 }
  0x11   :  { %p4740_p7 = pnand %p4739_p6, %p4733_p3 }
  0x13   :  { %4743 = shalt.err (!%p4740_p7)
}
  0x14   :  { %38 = dma.hbm_to_vmem [thread:$0]  %s5133_s1, 256, %s36_s10, [#allocation6]  }
  0x15   :  { %s4744_s25 = scalar_lea.hbm %s5136_s4, 64 }
  0x16   :  { %p4745_p8 = scmp.ne.s32.totalorder %s5136_s4, %s4744_s25  ;;  %p4748_p9 = scmp.lt.u32.totalorder %s4744_s25, %s5136_s4 }
  0x18   :  { %p4750_p10 = pnand %p4748_p9, %p4745_p8 }
  0x1a   :  { %4753 = shalt.err (!%p4750_p10)
}
  0x1b   :  { %s4754_s30 = scalar_lea.vmem %s60_s12, 64  ;;  %p4759_p12 = scmp.lt.s32.totalorder %s60_s12, %s60_s12 }
  0x1c   :  { %p4755_p11 = scmp.ne.s32.totalorder %s60_s12, %s4754_s30  ;;  %p4760_p13 = scmp.lt.s32.totalorder %s4754_s30, %s4754_s30 }
  0x1e   :  { %p4761_p0 = por %p4760_p13, %p4759_p12 }
  0x20   :  { %p4762_p1 = pnand %p4761_p0, %p4755_p11 }
  0x22   :  { %4765 = shalt.err (!%p4762_p1)
}
  0x23   :  { %62 = dma.hbm_to_vmem [thread:$0]  %s5136_s4, 64, %s60_s12, [#allocation9]  }
  0x24   :  { %s4888_s11 = smov [#allocation2]   ;;  %s4889_s14 = smov [#allocation7]  }
  0x25   :  { %s25_s13 = sshll.u32 %s4888_s11, 4  ;;  %s46_s15 = sshll.u32 %s4889_s14, 4  ;;  %s26_s13 = int_to_ptr.vmem [resolvable:$true] %s25_s13  ;;  %s4974_s15 = int_to_ptr.vmem [resolvable:$true] %s46_s15 }
  0x26   :  { %s4766_s18 = scalar_lea.hbm %s5132_s0, 128 }
  0x27   :  { %p4767_p2 = scmp.ne.s32.totalorder %s5132_s0, %s4766_s18  ;;  %p4770_p3 = scmp.lt.u32.totalorder %s4766_s18, %s5132_s0 }
  0x29   :  { %p4772_p4 = pnand %p4770_p3, %p4767_p2 }
  0x2b   :  { %4775 = shalt.err (!%p4772_p4)
}
  0x2c   :  { %s4776_s4 = scalar_lea.vmem %s26_s13, 128  ;;  %p4781_p6 = scmp.lt.s32.totalorder %s26_s13, %s26_s13 }
  0x2d   :  { %p4777_p5 = scmp.ne.s32.totalorder %s26_s13, %s4776_s4  ;;  %p4782_p7 = scmp.lt.s32.totalorder %s4776_s4, %s4776_s4 }
  0x2f   :  { %p4783_p8 = por %p4782_p7, %p4781_p6 }
  0x31   :  { %p4784_p9 = pnand %p4783_p8, %p4777_p5 }
  0x33   :  { %4787 = shalt.err (!%p4784_p9)
}
  0x34   :  { %28 = dma.hbm_to_vmem [thread:$0]  %s5132_s0, 128, %s26_s13, [#allocation3]  }
  0x35   :  { %s4788_s26 = scalar_lea.hbm %s5135_s3, 16384 }
  0x36   :  { %p4789_p10 = scmp.ne.s32.totalorder %s5135_s3, %s4788_s26  ;;  %p4792_p11 = scmp.lt.u32.totalorder %s4788_s26, %s5135_s3 }
  0x38   :  { %p4794_p12 = pnand %p4792_p11, %p4789_p10 }
  0x3a   :  { %4797 = shalt.err (!%p4794_p12)
}
  0x3b   :  { %s4798_s1 = scalar_lea.vmem %s4974_s15, 16384  ;;  %p4803_p0 = scmp.lt.s32.totalorder %s4974_s15, %s4974_s15 }
  0x3c   :  { %p4799_p13 = scmp.ne.s32.totalorder %s4974_s15, %s4798_s1  ;;  %p4804_p1 = scmp.lt.s32.totalorder %s4798_s1, %s4798_s1 }
  0x3e   :  { %p4805_p2 = por %p4804_p1, %p4803_p0 }
  0x40   :  { %p4806_p3 = pnand %p4805_p2, %p4799_p13 }
  0x42   :  { %4809 = shalt.err (!%p4806_p3)
}
  0x43   :  { %s4890_s0 = smov 256   ;;  %s4891_s10 = smov 16  }
  0x44   :  { %52 = dma.hbm_to_vmem [thread:$0]  %s5135_s3, 16384, %s4974_s15, [#allocation6], %s4890_s0, %s4890_s0, %s4891_s10  }
  0x45   :  { %s4892_s14 = smov [#allocation10]   ;;  %s4810_s19 = scalar_lea.hbm %s5137_s5, 32768 }
  0x46   :  { %s68_s16 = sshll.u32 %s4892_s14, 4  ;;  %p4811_p4 = scmp.ne.s32.totalorder %s5137_s5, %s4810_s19  ;;  %s69_s16 = int_to_ptr.vmem [resolvable:$true] %s68_s16 }
  0x47   :  { %p4814_p5 = scmp.lt.u32.totalorder %s4810_s19, %s5137_s5 }
  0x49   :  { %p4816_p6 = pnand %p4814_p5, %p4811_p4 }
  0x4b   :  { %4819 = shalt.err (!%p4816_p6)
}
  0x4c   :  { %s4820_s12 = scalar_lea.vmem %s69_s16, 32768  ;;  %p4825_p8 = scmp.lt.s32.totalorder %s69_s16, %s69_s16 }
  0x4d   :  { %p4821_p7 = scmp.ne.s32.totalorder %s69_s16, %s4820_s12  ;;  %p4826_p9 = scmp.lt.s32.totalorder %s4820_s12, %s4820_s12 }
  0x4f   :  { %p4827_p10 = por %p4826_p9, %p4825_p8 }
  0x51   :  { %p4828_p11 = pnand %p4827_p10, %p4821_p7 }
  0x53   :  { %4831 = shalt.err (!%p4828_p11)
}
  0x54   :  { %s4893_s3 = smov 512   ;;  %s4894_s15 = smov 32  }
  0x55   :  { %74 = dma.hbm_to_vmem [thread:$0]  %s5137_s5, 32768, %s69_s16, [#allocation9], %s4893_s3, %s4893_s3, %s4894_s15  }
  0x56   :  { %s4895_s25 = smov [#allocation11]   ;;  %s4832_s29 = scalar_lea.hbm %s5139_s7, 8192 }
  0x57   :  { %s82_s26 = sshll.u32 %s4895_s25, 4  ;;  %p4833_p12 = scmp.ne.s32.totalorder %s5139_s7, %s4832_s29  ;;  %s83_s26 = int_to_ptr.vmem [resolvable:$true] %s82_s26 }
  0x58   :  { %p4836_p13 = scmp.lt.u32.totalorder %s4832_s29, %s5139_s7 }
  0x5a   :  { %p4838_p0 = pnand %p4836_p13, %p4833_p12 }
  0x5c   :  { %4841 = shalt.err (!%p4838_p0)
}
  0x5d   :  { %s4842_s11 = scalar_lea.vmem %s83_s26, 8192  ;;  %p4847_p2 = scmp.lt.s32.totalorder %s83_s26, %s83_s26 }
  0x5e   :  { %p4843_p1 = scmp.ne.s32.totalorder %s83_s26, %s4842_s11  ;;  %p4848_p3 = scmp.lt.s32.totalorder %s4842_s11, %s4842_s11 }
  0x60   :  { %p4849_p4 = por %p4848_p3, %p4847_p2 }
  0x62   :  { %p4850_p5 = pnand %p4849_p4, %p4843_p1 }
  0x64   :  { %4853 = shalt.err (!%p4850_p5)
}
  0x65   :  { %s4896_s5 = smov 64   ;;  %s4897_s13 = smov 4  }
  0x66   :  { %88 = dma.hbm_to_vmem [thread:$0]  %s5139_s7, 8192, %s83_s26, [#allocation12], %s4896_s5, %s4896_s5, %s4897_s13  }
  0x67   :  { %4876 = dma.done.wait [#allocation3], 128  }
  0x68   :  { %4877 = vsyncadd [#allocation3], 4294967168 }
  0x69   :  { %4878 = dma.done.wait [#allocation6], 16640  }
  0x6a   :  { %4879 = vsyncadd [#allocation6], 4294950656 }
  0x6b   :  { %4880 = dma.done.wait [#allocation9], 32832  }
  0x6c   :  { %4881 = vsyncadd [#allocation9], 4294934464 }
  0x6d   :  { %4882 = dma.done.wait [#allocation12], 8192  }
  0x6e   :  { %4883 = vsyncadd [#allocation12], 4294959104  ;;  %v4898_v0 = vmov 0   ;;  %v112_v1 = vld [vmem:[#allocation5] sm:$0xff]  ;;  %vm150_vm0 = vcmask 1043456   ;;  %v110_v2 = vld [vmem:[#allocation2] sm:$0xff] }
  0x6f   :  { %195 = vmatprep.mubr.bf16.mxu0 %v4898_v0  ;;  %236 = vmatprep.mubr.bf16.mxu1 %v4898_v0  ;;  %v113_v3 = vld [vmem:[#allocation5 + $0x8] sm:$0xff]  ;;  %v3836_v4 = vcombine.high %v112_v1, %v112_v1  ;;  %v3835_v5 = vcombine.low %v112_v1, %v112_v1  ;;  %v4436_v8 = vld [vmem:[#allocation7 + $0x4] ss:$16 sps:$4 sm:$0xff]   ;;  %v111_v10 = vpack.c.bf16 %v110_v2, %v110_v2  ;;  %vm146_vm1 = vcmask 64512   ;;  %v4434_v13 = vld [vmem:[#allocation7] ss:$16 sps:$4 sm:$0xff]  }
  0x70   :  { %v3838_v6 = vcombine.high %v113_v3, %v113_v3  ;;  %v3837_v7 = vcombine.low %v113_v3, %v113_v3  ;;  %v4439_v11 = vld [vmem:[#allocation7 + $0xc] ss:$16 sps:$4 sm:$0xff]   ;;  %v4437_v14 = vld [vmem:[#allocation7 + $0x8] ss:$16 sps:$4 sm:$0xff]   ;;  %v4442_v15 = vld [vmem:[#allocation7 + $0x24] ss:$16 sps:$4 sm:$0xff]  }
  0x71   :  { %3839 = vmatprep.subr.msk.bf16.mxu0 %vm150_vm0, %v3836_v4  ;;  %v152_v9 = vsel %vm150_vm0, %v3835_v5, 0  ;;  %v4445_v16 = vld [vmem:[#allocation7 + $0x2c] ss:$16 sps:$4 sm:$0xff]   ;;  %v4440_v17 = vld [vmem:[#allocation7 + $0x20] ss:$16 sps:$4 sm:$0xff]  }
  0x72   :  { %3841 = vmatprep.subr.msk.bf16.mxu1 %vm150_vm0, %v3838_v6  ;;  %164 = vmatpush1.bf16.msra.mxu0 %v152_v9  ;;  %v158_v12 = vsel %vm150_vm0, %v3837_v7, 0  ;;  %v4443_v18 = vld [vmem:[#allocation7 + $0x28] ss:$16 sps:$4 sm:$0xff]   ;;  %v4448_v19 = vld [vmem:[#allocation7 + $0x44] ss:$16 sps:$4 sm:$0xff]  }
  0x73   :  { %205 = vmatpush1.bf16.msra.mxu1 %v158_v12  ;;  %1043 = vmatprep.subr.bf16.mxu0 %v4436_v8  ;;  %v4451_v20 = vld [vmem:[#allocation7 + $0x4c] ss:$16 sps:$4 sm:$0xff]   ;;  %v4446_v21 = vld [vmem:[#allocation7 + $0x40] ss:$16 sps:$4 sm:$0xff]   ;;  %v4449_v22 = vld [vmem:[#allocation7 + $0x48] ss:$16 sps:$4 sm:$0xff]  }
  0x74   :  { %1125 = vmatprep.subr.bf16.mxu1 %v4439_v11  ;;  %v4454_v23 = vld [vmem:[#allocation7 + $0x64] ss:$16 sps:$4 sm:$0xff]   ;;  %v4457_v24 = vld [vmem:[#allocation7 + $0x6c] ss:$16 sps:$4 sm:$0xff]   ;;  %v4452_v25 = vld [vmem:[#allocation7 + $0x60] ss:$16 sps:$4 sm:$0xff]  }
  0x75   :  { %3840 = vmatmul.mubr.msk.bf16.vlgmr.msra.gmra.mrb[0].mxu0 %vm146_vm1, %v111_v10  ;;  %v4455_v26 = vld [vmem:[#allocation7 + $0x68] ss:$16 sps:$4 sm:$0xff]   ;;  %v4460_v27 = vld [vmem:[#allocation7 + $0x84] ss:$16 sps:$4 sm:$0xff]   ;;  %v4463_v28 = vld [vmem:[#allocation7 + $0x8c] ss:$16 sps:$4 sm:$0xff]  }
  0x76   :  { %3842 = vmatmul.mubr.msk.bf16.vlgmr.msra.gmra.mrb[0].mxu1 %vm146_vm1, %v111_v10  ;;  %1044 = vmatpush1.bf16.msra.mxu0 %v4434_v13  ;;  %v4458_v29 = vld [vmem:[#allocation7 + $0x80] ss:$16 sps:$4 sm:$0xff]   ;;  %v4461_v30 = vld [vmem:[#allocation7 + $0x88] ss:$16 sps:$4 sm:$0xff]   ;;  %v4466_v31 = vld [vmem:[#allocation7 + $0xa4] ss:$16 sps:$4 sm:$0xff]   ;;  %v116_v13 = vlaneseq }
  0x77   :  { %1126 = vmatpush1.bf16.msra.mxu1 %v4437_v14  ;;  %1045 = vmatprep.subr.bf16.mxu0 %v4442_v15  ;;  %v4469_v32 = vld [vmem:[#allocation7 + $0xac] ss:$16 sps:$4 sm:$0xff]   ;;  %v4464_v33 = vld [vmem:[#allocation7 + $0xa0] ss:$16 sps:$4 sm:$0xff]   ;;  %v4467_v34 = vld [vmem:[#allocation7 + $0xa8] ss:$16 sps:$4 sm:$0xff]  }
  0x78   :  { %1127 = vmatprep.subr.bf16.mxu1 %v4445_v16  ;;  %v4472_v35 = vld [vmem:[#allocation7 + $0xc4] ss:$16 sps:$4 sm:$0xff]   ;;  %v4475_v36 = vld [vmem:[#allocation7 + $0xcc] ss:$16 sps:$4 sm:$0xff]   ;;  %v4470_v37 = vld [vmem:[#allocation7 + $0xc0] ss:$16 sps:$4 sm:$0xff]  }
  0x79   :  { %v4473_v38 = vld [vmem:[#allocation7 + $0xc8] ss:$16 sps:$4 sm:$0xff]   ;;  %v4478_v39 = vld [vmem:[#allocation7 + $0xe4] ss:$16 sps:$4 sm:$0xff]   ;;  %v4481_v40 = vld [vmem:[#allocation7 + $0xec] ss:$16 sps:$4 sm:$0xff]  }
  0x7a   :  { %1046 = vmatpush1.bf16.msra.mxu0 %v4440_v17  ;;  %v4476_v41 = vld [vmem:[#allocation7 + $0xe0] ss:$16 sps:$4 sm:$0xff]   ;;  %v4479_v42 = vld [vmem:[#allocation7 + $0xe8] ss:$16 sps:$4 sm:$0xff]   ;;  %v4484_v43 = vld [vmem:[#allocation7 + $0x104] ss:$16 sps:$4 sm:$0xff]  }
  0x7b   :  { %1128 = vmatpush1.bf16.msra.mxu1 %v4443_v18  ;;  %1047 = vmatprep.subr.bf16.mxu0 %v4448_v19  ;;  %v4487_v44 = vld [vmem:[#allocation7 + $0x10c] ss:$16 sps:$4 sm:$0xff]   ;;  %v4482_v45 = vld [vmem:[#allocation7 + $0x100] ss:$16 sps:$4 sm:$0xff]   ;;  %v4485_v46 = vld [vmem:[#allocation7 + $0x108] ss:$16 sps:$4 sm:$0xff]  }
  0x7c   :  { %1129 = vmatprep.subr.bf16.mxu1 %v4451_v20  ;;  %v4490_v47 = vld [vmem:[#allocation7 + $0x124] ss:$16 sps:$4 sm:$0xff]   ;;  %v4493_v48 = vld [vmem:[#allocation7 + $0x12c] ss:$16 sps:$4 sm:$0xff]   ;;  %v4488_v49 = vld [vmem:[#allocation7 + $0x120] ss:$16 sps:$4 sm:$0xff]  }
  0x7d   :  { %v4491_v50 = vld [vmem:[#allocation7 + $0x128] ss:$16 sps:$4 sm:$0xff]   ;;  %v4496_v51 = vld [vmem:[#allocation7 + $0x144] ss:$16 sps:$4 sm:$0xff]   ;;  %v4499_v52 = vld [vmem:[#allocation7 + $0x14c] ss:$16 sps:$4 sm:$0xff]  }
  0x7e   :  { %1048 = vmatpush1.bf16.msra.mxu0 %v4446_v21  ;;  %v4494_v53 = vld [vmem:[#allocation7 + $0x140] ss:$16 sps:$4 sm:$0xff]   ;;  %v4497_v54 = vld [vmem:[#allocation7 + $0x148] ss:$16 sps:$4 sm:$0xff]   ;;  %v4502_v55 = vld [vmem:[#allocation7 + $0x164] ss:$16 sps:$4 sm:$0xff]  }
  0x7f   :  { %1130 = vmatpush1.bf16.msra.mxu1 %v4449_v22  ;;  %1049 = vmatprep.subr.bf16.mxu0 %v4454_v23  ;;  %v4505_v56 = vld [vmem:[#allocation7 + $0x16c] ss:$16 sps:$4 sm:$0xff]   ;;  %v4500_v57 = vld [vmem:[#allocation7 + $0x160] ss:$16 sps:$4 sm:$0xff]   ;;  %v4503_v58 = vld [vmem:[#allocation7 + $0x168] ss:$16 sps:$4 sm:$0xff]  }
  0x80   :  { %1131 = vmatprep.subr.bf16.mxu1 %v4457_v24  ;;  %v4508_v59 = vld [vmem:[#allocation7 + $0x184] ss:$16 sps:$4 sm:$0xff]   ;;  %v4511_v60 = vld [vmem:[#allocation7 + $0x18c] ss:$16 sps:$4 sm:$0xff]   ;;  %v4506_v61 = vld [vmem:[#allocation7 + $0x180] ss:$16 sps:$4 sm:$0xff]  }
  0x81   :  { %v4509_v62 = vld [vmem:[#allocation7 + $0x188] ss:$16 sps:$4 sm:$0xff]   ;;  %v4514_v63 = vld [vmem:[#allocation7 + $0x1a4] ss:$16 sps:$4 sm:$0xff]   ;;  %v4517_v0 = vld [vmem:[#allocation7 + $0x1ac] ss:$16 sps:$4 sm:$0xff]  }
  0x82   :  { %1050 = vmatpush1.bf16.msra.mxu0 %v4452_v25  ;;  %v4512_v1 = vld [vmem:[#allocation7 + $0x1a0] ss:$16 sps:$4 sm:$0xff]   ;;  %v4515_v2 = vld [vmem:[#allocation7 + $0x1a8] ss:$16 sps:$4 sm:$0xff]   ;;  %v4520_v3 = vld [vmem:[#allocation7 + $0x1c4] ss:$16 sps:$4 sm:$0xff]  }
  0x83   :  { %1132 = vmatpush1.bf16.msra.mxu1 %v4455_v26  ;;  %1051 = vmatprep.subr.bf16.mxu0 %v4460_v27  ;;  %v4523_v4 = vld [vmem:[#allocation7 + $0x1cc] ss:$16 sps:$4 sm:$0xff]   ;;  %v4518_v5 = vld [vmem:[#allocation7 + $0x1c0] ss:$16 sps:$4 sm:$0xff]   ;;  %v4521_v6 = vld [vmem:[#allocation7 + $0x1c8] ss:$16 sps:$4 sm:$0xff]  }
  0x84   :  { %1133 = vmatprep.subr.bf16.mxu1 %v4463_v28  ;;  %v4526_v7 = vld [vmem:[#allocation7 + $0x1e4] ss:$16 sps:$4 sm:$0xff]   ;;  %v4529_v8 = vld [vmem:[#allocation7 + $0x1ec] ss:$16 sps:$4 sm:$0xff]   ;;  %v4524_v9 = vld [vmem:[#allocation7 + $0x1e0] ss:$16 sps:$4 sm:$0xff]  }
  0x85   :  { %v4527_v10 = vld [vmem:[#allocation7 + $0x1e8] ss:$16 sps:$4 sm:$0xff]   ;;  %v4532_v11 = vld [vmem:[#allocation7 + $0x204] ss:$16 sps:$4 sm:$0xff]   ;;  %v4535_v12 = vld [vmem:[#allocation7 + $0x20c] ss:$16 sps:$4 sm:$0xff]  }
  0x86   :  { %1052 = vmatpush1.bf16.msra.mxu0 %v4458_v29  ;;  %v5029_v14 = vshrl.u32 %v116_v13, 7  ;;  %v5037_v16 = vld [vmem:[%s5134_s2] sm:$0xf]  ;;  %v4592_v13 = vld [vmem:[#allocation7 + $0x344] ss:$16 sps:$4 sm:$0xff]  }
  0x87   :  { %1134 = vmatpush1.bf16.msra.mxu1 %v4461_v30  ;;  %1053 = vmatprep.subr.bf16.mxu0 %v4466_v31 }
  0x88   :  { %1135 = vmatprep.subr.bf16.mxu1 %v4469_v32  ;;  %v5032_v15 = vsub.s32 0, %v5029_v14  ;;  %v5040_v17 = vsub.s32 1, %v5029_v14  ;;  %v5043_v18 = vsub.s32 3, %v5029_v14 }
  0x8a   :  { %1054 = vmatpush1.bf16.msra.mxu0 %v4464_v33  ;;  %v119_v19 = vrot.slane %v5037_v16, %v5032_v15  ;;  %v123_v20 = vrot.slane %v5037_v16, %v5040_v17  ;;  %v131_v21 = vrot.slane %v5037_v16, %v5043_v18 }
  0x8b   :  { %1136 = vmatpush1.bf16.msra.mxu1 %v4467_v34  ;;  %1055 = vmatprep.subr.bf16.mxu0 %v4472_v35 }
  0x8c   :  { %1137 = vmatprep.subr.bf16.mxu1 %v4475_v36  ;;  %v4530_v36 = vld [vmem:[#allocation7 + $0x200] ss:$16 sps:$4 sm:$0xff]  }
  0x8e   :  { %1056 = vmatpush1.bf16.msra.mxu0 %v4470_v37  ;;  %v4533_v37 = vld [vmem:[#allocation7 + $0x208] ss:$16 sps:$4 sm:$0xff]  }
  0x8f   :  { %1138 = vmatpush1.bf16.msra.mxu1 %v4473_v38  ;;  %1057 = vmatprep.subr.bf16.mxu0 %v4478_v39 }
  0x90   :  { %1139 = vmatprep.subr.bf16.mxu1 %v4481_v40  ;;  %v4538_v40 = vld [vmem:[#allocation7 + $0x224] ss:$16 sps:$4 sm:$0xff]  }
  0x92   :  { %1058 = vmatpush1.bf16.msra.mxu0 %v4476_v41  ;;  %v4541_v41 = vld [vmem:[#allocation7 + $0x22c] ss:$16 sps:$4 sm:$0xff]  }
  0x93   :  { %1140 = vmatpush1.bf16.msra.mxu1 %v4479_v42  ;;  %1059 = vmatprep.subr.bf16.mxu0 %v4484_v43  ;;  %v4536_v43 = vld [vmem:[#allocation7 + $0x220] ss:$16 sps:$4 sm:$0xff]  }
  0x94   :  { %1141 = vmatprep.subr.bf16.mxu1 %v4487_v44  ;;  %v4539_v44 = vld [vmem:[#allocation7 + $0x228] ss:$16 sps:$4 sm:$0xff]  }
  0x96   :  { %1060 = vmatpush1.bf16.msra.mxu0 %v4482_v45  ;;  %v4544_v45 = vld [vmem:[#allocation7 + $0x244] ss:$16 sps:$4 sm:$0xff]  }
  0x97   :  { %1142 = vmatpush1.bf16.msra.mxu1 %v4485_v46  ;;  %1061 = vmatprep.subr.bf16.mxu0 %v4490_v47  ;;  %v4547_v46 = vld [vmem:[#allocation7 + $0x24c] ss:$16 sps:$4 sm:$0xff]   ;;  %v4542_v47 = vld [vmem:[#allocation7 + $0x240] ss:$16 sps:$4 sm:$0xff]  }
  0x98   :  { %1143 = vmatprep.subr.bf16.mxu1 %v4493_v48  ;;  %v4545_v48 = vld [vmem:[#allocation7 + $0x248] ss:$16 sps:$4 sm:$0xff]  }
  0x9a   :  { %1062 = vmatpush1.bf16.msra.mxu0 %v4488_v49  ;;  %v4550_v49 = vld [vmem:[#allocation7 + $0x264] ss:$16 sps:$4 sm:$0xff]  }
  0x9b   :  { %1144 = vmatpush1.bf16.msra.mxu1 %v4491_v50  ;;  %1063 = vmatprep.subr.bf16.mxu0 %v4496_v51  ;;  %v4553_v50 = vld [vmem:[#allocation7 + $0x26c] ss:$16 sps:$4 sm:$0xff]   ;;  %v4548_v51 = vld [vmem:[#allocation7 + $0x260] ss:$16 sps:$4 sm:$0xff]  }
  0x9c   :  { %1145 = vmatprep.subr.bf16.mxu1 %v4499_v52  ;;  %v4551_v52 = vld [vmem:[#allocation7 + $0x268] ss:$16 sps:$4 sm:$0xff]  }
  0x9e   :  { %1064 = vmatpush1.bf16.msra.mxu0 %v4494_v53  ;;  %v4556_v53 = vld [vmem:[#allocation7 + $0x284] ss:$16 sps:$4 sm:$0xff]  }
  0x9f   :  { %1146 = vmatpush1.bf16.msra.mxu1 %v4497_v54  ;;  %1065 = vmatprep.subr.bf16.mxu0 %v4502_v55  ;;  %v4559_v54 = vld [vmem:[#allocation7 + $0x28c] ss:$16 sps:$4 sm:$0xff]   ;;  %v4554_v55 = vld [vmem:[#allocation7 + $0x280] ss:$16 sps:$4 sm:$0xff]  }
  0xa0   :  { %1147 = vmatprep.subr.bf16.mxu1 %v4505_v56  ;;  %v4557_v56 = vld [vmem:[#allocation7 + $0x288] ss:$16 sps:$4 sm:$0xff]  }
  0xa2   :  { %1066 = vmatpush1.bf16.msra.mxu0 %v4500_v57  ;;  %v4562_v57 = vld [vmem:[#allocation7 + $0x2a4] ss:$16 sps:$4 sm:$0xff]  }
  0xa3   :  { %1148 = vmatpush1.bf16.msra.mxu1 %v4503_v58  ;;  %1067 = vmatprep.subr.bf16.mxu0 %v4508_v59  ;;  %v4565_v58 = vld [vmem:[#allocation7 + $0x2ac] ss:$16 sps:$4 sm:$0xff]   ;;  %v4560_v59 = vld [vmem:[#allocation7 + $0x2a0] ss:$16 sps:$4 sm:$0xff]  }
  0xa4   :  { %1149 = vmatprep.subr.bf16.mxu1 %v4511_v60  ;;  %v4563_v60 = vld [vmem:[#allocation7 + $0x2a8] ss:$16 sps:$4 sm:$0xff]  }
  0xa6   :  { %1068 = vmatpush1.bf16.msra.mxu0 %v4506_v61  ;;  %v4568_v61 = vld [vmem:[#allocation7 + $0x2c4] ss:$16 sps:$4 sm:$0xff]  }
  0xa7   :  { %1150 = vmatpush1.bf16.msra.mxu1 %v4509_v62  ;;  %1069 = vmatprep.subr.bf16.mxu0 %v4514_v63  ;;  %v4571_v62 = vld [vmem:[#allocation7 + $0x2cc] ss:$16 sps:$4 sm:$0xff]   ;;  %v4566_v63 = vld [vmem:[#allocation7 + $0x2c0] ss:$16 sps:$4 sm:$0xff]  }
  0xa8   :  { %1151 = vmatprep.subr.bf16.mxu1 %v4517_v0  ;;  %v4569_v0 = vld [vmem:[#allocation7 + $0x2c8] ss:$16 sps:$4 sm:$0xff]  }
  0xaa   :  { %1070 = vmatpush1.bf16.msra.mxu0 %v4512_v1  ;;  %v4574_v1 = vld [vmem:[#allocation7 + $0x2e4] ss:$16 sps:$4 sm:$0xff]  }
  0xab   :  { %1152 = vmatpush1.bf16.msra.mxu1 %v4515_v2  ;;  %1071 = vmatprep.subr.bf16.mxu0 %v4520_v3  ;;  %v4577_v2 = vld [vmem:[#allocation7 + $0x2ec] ss:$16 sps:$4 sm:$0xff]   ;;  %v4572_v3 = vld [vmem:[#allocation7 + $0x2e0] ss:$16 sps:$4 sm:$0xff]  }
  0xac   :  { %1153 = vmatprep.subr.bf16.mxu1 %v4523_v4  ;;  %v4575_v4 = vld [vmem:[#allocation7 + $0x2e8] ss:$16 sps:$4 sm:$0xff]  }
  0xae   :  { %1072 = vmatpush1.bf16.msra.mxu0 %v4518_v5  ;;  %v4580_v5 = vld [vmem:[#allocation7 + $0x304] ss:$16 sps:$4 sm:$0xff]  }
  0xaf   :  { %1154 = vmatpush1.bf16.msra.mxu1 %v4521_v6  ;;  %1073 = vmatprep.subr.bf16.mxu0 %v4526_v7  ;;  %v4583_v6 = vld [vmem:[#allocation7 + $0x30c] ss:$16 sps:$4 sm:$0xff]   ;;  %v4578_v7 = vld [vmem:[#allocation7 + $0x300] ss:$16 sps:$4 sm:$0xff]  }
  0xb0   :  { %1155 = vmatprep.subr.bf16.mxu1 %v4529_v8  ;;  %v4581_v8 = vld [vmem:[#allocation7 + $0x308] ss:$16 sps:$4 sm:$0xff]  }
  0xb2   :  { %1074 = vmatpush1.bf16.msra.mxu0 %v4524_v9  ;;  %v4586_v9 = vld [vmem:[#allocation7 + $0x324] ss:$16 sps:$4 sm:$0xff]  }
  0xb3   :  { %1156 = vmatpush1.bf16.msra.mxu1 %v4527_v10  ;;  %1084 = vmatprep.subr.bf16.mxu0 %v4532_v11  ;;  %v4589_v10 = vld [vmem:[#allocation7 + $0x32c] ss:$16 sps:$4 sm:$0xff]   ;;  %v4584_v11 = vld [vmem:[#allocation7 + $0x320] ss:$16 sps:$4 sm:$0xff]  }
  0xb4   :  { %1166 = vmatprep.subr.bf16.mxu1 %v4535_v12  ;;  %v4587_v12 = vld [vmem:[#allocation7 + $0x328] ss:$16 sps:$4 sm:$0xff]  }
 0x148   :  { %v197_v22 = vpop.f32.mrb[0].mxu0 }
 0x149   :  { %v198_v23 = vadd.f32 %v197_v22, %v119_v19  ;;  %v199_v24 = vpop.f32.mrb[1].mxu0  ;;  %v5051_v25 = vpop.f32.mrb[0].mxu1  ;;  %v4595_v19 = vld [vmem:[#allocation7 + $0x34c] ss:$16 sps:$4 sm:$0xff]   ;;  %v5054_v22 = vsub.s32 2, %v5029_v14 }
 0x14a   :  { %v200_v26 = vadd.f32 %v199_v24, %v123_v20  ;;  %v201_v27 = vpop.f32.mrb[2].mxu0  ;;  %v240_v28 = vpop.f32.mrb[1].mxu1  ;;  %v4590_v20 = vld [vmem:[#allocation7 + $0x340] ss:$16 sps:$4 sm:$0xff]   ;;  %v4601_v24 = vld [vmem:[#allocation7 + $0x36c] ss:$16 sps:$4 sm:$0xff]  }
 0x14b   :  { %4690 = vtanh.f32 %v198_v23  ;;  %v202_v29 = vpop.f32.mrb[3].mxu0  ;;  %v241_v30 = vadd.f32 %v240_v28, %v131_v21  ;;  %v242_v31 = vpop.f32.mrb[2].mxu1  ;;  %v4593_v21 = vld [vmem:[#allocation7 + $0x348] ss:$16 sps:$4 sm:$0xff]   ;;  %v4598_v23 = vld [vmem:[#allocation7 + $0x364] ss:$16 sps:$4 sm:$0xff]  }
 0x14c   :  { %4692 = vtanh.f32 %v200_v26  ;;  %v243_v32 = vpop.f32.mrb[3].mxu1  ;;  %v127_v26 = vrot.slane %v5037_v16, %v5054_v22  ;;  %v4596_v27 = vld [vmem:[#allocation7 + $0x360] ss:$16 sps:$4 sm:$0xff]   ;;  %v4599_v28 = vld [vmem:[#allocation7 + $0x368] ss:$16 sps:$4 sm:$0xff]  }
 0x14d   :  { %4694 = vtanh.f32 %v241_v30  ;;  %v4604_v29 = vld [vmem:[#allocation7 + $0x384] ss:$16 sps:$4 sm:$0xff]   ;;  %v4607_v30 = vld [vmem:[#allocation7 + $0x38c] ss:$16 sps:$4 sm:$0xff]   ;;  %v4602_v32 = vld [vmem:[#allocation7 + $0x380] ss:$16 sps:$4 sm:$0xff]  }
 0x14e   :  { %v239_v31 = vadd.f32 %v5051_v25, %v127_v26  ;;  %v4608_v16 = vld [vmem:[#allocation7 + $0x3a0] ss:$16 sps:$4 sm:$0xff]  }
 0x14f   :  { %v4614_v25 = vld [vmem:[#allocation7 + $0x3c0] ss:$16 sps:$4 sm:$0xff]  }
 0x150   :  { %4696 = vtanh.f32 %v239_v31 }
 0x155   :  { %v4691_v33 = vpop.eup %4690 }
 0x156   :  { %v4693_v34 = vpop.eup %4692  ;;  %v249_v39 = vpack.c.bf16 %v4691_v33, %v4691_v33  ;;  %v4605_v33 = vld [vmem:[#allocation7 + $0x388] ss:$16 sps:$4 sm:$0xff]  }
 0x157   :  { %v250_v35 = vpack.c.bf16 %v4693_v34, %v4693_v34  ;;  %v4695_v38 = vpop.eup %4694  ;;  %v4610_v34 = vld [vmem:[#allocation7 + $0x3a4] ss:$16 sps:$4 sm:$0xff]  }
 0x158   :  { %v252_v42 = vpack.c.bf16 %v4695_v38, %v4695_v38  ;;  %v4619_v38 = vld [vmem:[#allocation7 + $0x3cc] ss:$16 sps:$4 sm:$0xff]  }
 0x159   :  { %1075 = vmatprep.mubr.bf16.mxu0 %v250_v35  ;;  %1157 = vmatprep.mubr.bf16.mxu1 %v250_v35  ;;  %v4613_v35 = vld [vmem:[#allocation7 + $0x3ac] ss:$16 sps:$4 sm:$0xff]  }
 0x15a   :  { %1076 = vmatmul.mubr.bf16.vlgmr.msra.gmra.mrb[4].mxu0 %v249_v39  ;;  %1158 = vmatmul.mubr.bf16.vlgmr.msra.gmra.mrb[4].mxu1 %v249_v39  ;;  %v4617_v39 = vld [vmem:[#allocation7 + $0x3c8] ss:$16 sps:$4 sm:$0xff]  }
 0x15b   :  { %1085 = vmatpush1.bf16.msra.mxu0 %v4530_v36  ;;  %1167 = vmatpush1.bf16.msra.mxu1 %v4533_v37  ;;  %v4611_v36 = vld [vmem:[#allocation7 + $0x3a8] ss:$16 sps:$4 sm:$0xff]   ;;  %v4616_v37 = vld [vmem:[#allocation7 + $0x3c4] ss:$16 sps:$4 sm:$0xff]  }
 0x15c   :  { %1086 = vmatprep.subr.bf16.mxu0 %v4538_v40  ;;  %1168 = vmatprep.subr.bf16.mxu1 %v4541_v41  ;;  %v4622_v40 = vld [vmem:[#allocation7 + $0x3e4] ss:$16 sps:$4 sm:$0xff]   ;;  %v4625_v41 = vld [vmem:[#allocation7 + $0x3ec] ss:$16 sps:$4 sm:$0xff]  }
 0x15d   :  { %1116 = vmatprep.mubr.bf16.mxu0 %v252_v42  ;;  %1198 = vmatprep.mubr.bf16.mxu1 %v252_v42  ;;  %v1215_v42 = vld [vmem:[#allocation10] sm:$0xff] }
 0x15f   :  { %1087 = vmatpush1.bf16.msra.mxu0 %v4536_v43  ;;  %1169 = vmatpush1.bf16.msra.mxu1 %v4539_v44  ;;  %v1219_v43 = vld [vmem:[#allocation10 + $0x20] sm:$0xff]  ;;  %v1216_v44 = vld [vmem:[#allocation10 + $0x8] sm:$0xff] }
 0x160   :  { %1088 = vmatprep.subr.bf16.mxu0 %v4544_v45  ;;  %1170 = vmatprep.subr.bf16.mxu1 %v4547_v46  ;;  %v1220_v45 = vld [vmem:[#allocation10 + $0x28] sm:$0xff] }
 0x161   :  { %v4620_v46 = vld [vmem:[#allocation7 + $0x3e0] ss:$16 sps:$4 sm:$0xff]  }
 0x163   :  { %1089 = vmatpush1.bf16.msra.mxu0 %v4542_v47  ;;  %1171 = vmatpush1.bf16.msra.mxu1 %v4545_v48  ;;  %v4623_v47 = vld [vmem:[#allocation7 + $0x3e8] ss:$16 sps:$4 sm:$0xff]   ;;  %v3972_v48 = vcombine.high %v1215_v42, %v1219_v43 }
 0x164   :  { %1090 = vmatprep.subr.bf16.mxu0 %v4550_v49  ;;  %1172 = vmatprep.subr.bf16.mxu1 %v4553_v50  ;;  %v3974_v49 = vcombine.high %v1216_v44, %v1220_v45  ;;  %v1223_v50 = vld [vmem:[#allocation10 + $0x40] sm:$0xff] }
 0x167   :  { %1091 = vmatpush1.bf16.msra.mxu0 %v4548_v51  ;;  %1173 = vmatpush1.bf16.msra.mxu1 %v4551_v52  ;;  %v4697_v51 = vpop.eup %4696  ;;  %v1227_v52 = vld [vmem:[#allocation10 + $0x60] sm:$0xff] }
 0x168   :  { %1092 = vmatprep.subr.bf16.mxu0 %v4556_v53  ;;  %1174 = vmatprep.subr.bf16.mxu1 %v4559_v54  ;;  %v1224_v53 = vld [vmem:[#allocation10 + $0x48] sm:$0xff] }
 0x169   :  { %v1228_v54 = vld [vmem:[#allocation10 + $0x68] sm:$0xff] }
 0x16b   :  { %1093 = vmatpush1.bf16.msra.mxu0 %v4554_v55  ;;  %1175 = vmatpush1.bf16.msra.mxu1 %v4557_v56  ;;  %v3971_v55 = vcombine.low %v1215_v42, %v1219_v43  ;;  %v3973_v56 = vcombine.low %v1216_v44, %v1220_v45  ;;  %v1275_v42 = vld [vmem:[#allocation10 + $0x1e0] sm:$0xff]  ;;  %v1272_v43 = vld [vmem:[#allocation10 + $0x1c8] sm:$0xff] }
 0x16c   :  { %1094 = vmatprep.subr.bf16.mxu0 %v4562_v57  ;;  %1176 = vmatprep.subr.bf16.mxu1 %v4565_v58  ;;  %v251_v57 = vpack.c.bf16 %v4697_v51, %v4697_v51  ;;  %v3980_v58 = vcombine.high %v1223_v50, %v1227_v52  ;;  %v1276_v44 = vld [vmem:[#allocation10 + $0x1e8] sm:$0xff] }
 0x16d   :  { %v1280_v51 = vld [vmem:[#allocation10 + $0x208] sm:$0xff] }
 0x16f   :  { %1095 = vmatpush1.bf16.msra.mxu0 %v4560_v59  ;;  %1177 = vmatpush1.bf16.msra.mxu1 %v4563_v60  ;;  %v3982_v59 = vcombine.high %v1224_v53, %v1228_v54  ;;  %v1231_v60 = vld [vmem:[#allocation10 + $0x80] sm:$0xff] }
 0x170   :  { %1096 = vmatprep.subr.bf16.mxu0 %v4568_v61  ;;  %1178 = vmatprep.subr.bf16.mxu1 %v4571_v62  ;;  %v1235_v61 = vld [vmem:[#allocation10 + $0xa0] sm:$0xff]  ;;  %v1232_v62 = vld [vmem:[#allocation10 + $0x88] sm:$0xff] }
 0x173   :  { %1097 = vmatpush1.bf16.msra.mxu0 %v4566_v63  ;;  %1179 = vmatpush1.bf16.msra.mxu1 %v4569_v0  ;;  %v1236_v63 = vld [vmem:[#allocation10 + $0xa8] sm:$0xff]  ;;  %v3979_v0 = vcombine.low %v1223_v50, %v1227_v52  ;;  %v1283_v50 = vld [vmem:[#allocation10 + $0x220] sm:$0xff] }
 0x174   :  { %1098 = vmatprep.subr.bf16.mxu0 %v4574_v1  ;;  %1180 = vmatprep.subr.bf16.mxu1 %v4577_v2  ;;  %v3981_v1 = vcombine.low %v1224_v53, %v1228_v54  ;;  %v3988_v2 = vcombine.high %v1231_v60, %v1235_v61  ;;  %v1284_v52 = vld [vmem:[#allocation10 + $0x228] sm:$0xff]  ;;  %v4029_v54 = vcombine.low %v1272_v43, %v1276_v44 }
 0x177   :  { %1099 = vmatpush1.bf16.msra.mxu0 %v4572_v3  ;;  %1181 = vmatpush1.bf16.msra.mxu1 %v4575_v4  ;;  %v3990_v3 = vcombine.high %v1232_v62, %v1236_v63  ;;  %v1239_v4 = vld [vmem:[#allocation10 + $0xc0] sm:$0xff] }
 0x178   :  { %1100 = vmatprep.subr.bf16.mxu0 %v4580_v5  ;;  %1182 = vmatprep.subr.bf16.mxu1 %v4583_v6  ;;  %v1243_v5 = vld [vmem:[#allocation10 + $0xe0] sm:$0xff]  ;;  %v1240_v6 = vld [vmem:[#allocation10 + $0xc8] sm:$0xff] }
 0x17b   :  { %1101 = vmatpush1.bf16.msra.mxu0 %v4578_v7  ;;  %1183 = vmatpush1.bf16.msra.mxu1 %v4581_v8  ;;  %v1244_v7 = vld [vmem:[#allocation10 + $0xe8] sm:$0xff]  ;;  %v3987_v8 = vcombine.low %v1231_v60, %v1235_v61 }
 0x17c   :  { %1102 = vmatprep.subr.bf16.mxu0 %v4586_v9  ;;  %1184 = vmatprep.subr.bf16.mxu1 %v4589_v10  ;;  %v3989_v9 = vcombine.low %v1232_v62, %v1236_v63  ;;  %v3996_v10 = vcombine.high %v1239_v4, %v1243_v5  ;;  %v1292_v60 = vld [vmem:[#allocation10 + $0x268] sm:$0xff]  ;;  %v4037_v62 = vcombine.low %v1280_v51, %v1284_v52 }
 0x17f   :  { %1103 = vmatpush1.bf16.msra.mxu0 %v4584_v11  ;;  %1185 = vmatpush1.bf16.msra.mxu1 %v4587_v12  ;;  %v3998_v11 = vcombine.high %v1240_v6, %v1244_v7  ;;  %v1247_v12 = vld [vmem:[#allocation10 + $0x100] sm:$0xff] }
 0x180   :  { %1104 = vmatprep.subr.bf16.mxu0 %v4592_v13  ;;  %1186 = vmatprep.subr.bf16.mxu1 %v4595_v19  ;;  %v1251_v13 = vld [vmem:[#allocation10 + $0x120] sm:$0xff]  ;;  %v1248_v19 = vld [vmem:[#allocation10 + $0x108] sm:$0xff] }
 0x181   :  { %v4003_v31 = vcombine.low %v1247_v12, %v1251_v13 }
 0x183   :  { %1105 = vmatpush1.bf16.msra.mxu0 %v4590_v20  ;;  %1187 = vmatpush1.bf16.msra.mxu1 %v4593_v21  ;;  %v1252_v20 = vld [vmem:[#allocation10 + $0x128] sm:$0xff]  ;;  %v3995_v21 = vcombine.low %v1239_v4, %v1243_v5 }
 0x184   :  { %1106 = vmatprep.subr.bf16.mxu0 %v4598_v23  ;;  %1188 = vmatprep.subr.bf16.mxu1 %v4601_v24  ;;  %v3997_v23 = vcombine.low %v1240_v6, %v1244_v7  ;;  %v4004_v24 = vcombine.high %v1247_v12, %v1251_v13  ;;  %v4006_v26 = vcombine.high %v1248_v19, %v1252_v20  ;;  %v1300_v4 = vld [vmem:[#allocation10 + $0x2a8] sm:$0xff] }
 0x185   :  { %v1308_v12 = vld [vmem:[#allocation10 + $0x2e8] sm:$0xff] }
 0x187   :  { %1107 = vmatpush1.bf16.msra.mxu0 %v4596_v27  ;;  %1189 = vmatpush1.bf16.msra.mxu1 %v4599_v28  ;;  %v1255_v27 = vld [vmem:[#allocation10 + $0x140] sm:$0xff] }
 0x188   :  { %1108 = vmatprep.subr.bf16.mxu0 %v4604_v29  ;;  %1190 = vmatprep.subr.bf16.mxu1 %v4607_v30  ;;  %v1259_v28 = vld [vmem:[#allocation10 + $0x160] sm:$0xff]  ;;  %v1256_v29 = vld [vmem:[#allocation10 + $0x148] sm:$0xff] }
 0x189   :  { %v1260_v30 = vld [vmem:[#allocation10 + $0x168] sm:$0xff] }
 0x18b   :  { %1109 = vmatpush1.bf16.msra.mxu0 %v4602_v32  ;;  %1191 = vmatpush1.bf16.msra.mxu1 %v4605_v33  ;;  %v4005_v32 = vcombine.low %v1248_v19, %v1252_v20  ;;  %v4012_v33 = vcombine.high %v1255_v27, %v1259_v28 }
 0x18c   :  { %1110 = vmatprep.subr.bf16.mxu0 %v4610_v34  ;;  %1192 = vmatprep.subr.bf16.mxu1 %v4613_v35  ;;  %v4014_v34 = vcombine.high %v1256_v29, %v1260_v30  ;;  %v1263_v35 = vld [vmem:[#allocation10 + $0x180] sm:$0xff] }
 0x18f   :  { %1111 = vmatpush1.bf16.msra.mxu0 %v4608_v16  ;;  %1193 = vmatpush1.bf16.msra.mxu1 %v4611_v36  ;;  %v1267_v16 = vld [vmem:[#allocation10 + $0x1a0] sm:$0xff]  ;;  %v1264_v36 = vld [vmem:[#allocation10 + $0x188] sm:$0xff] }
 0x190   :  { %1112 = vmatprep.subr.bf16.mxu0 %v4616_v37  ;;  %1194 = vmatprep.subr.bf16.mxu1 %v4619_v38  ;;  %v1268_v37 = vld [vmem:[#allocation10 + $0x1a8] sm:$0xff]  ;;  %v4011_v38 = vcombine.low %v1255_v27, %v1259_v28  ;;  %v4019_v45 = vcombine.low %v1263_v35, %v1267_v16  ;;  %v1315_v27 = vld [vmem:[#allocation10 + $0x320] sm:$0xff] }
 0x191   :  { %v1312_v28 = vld [vmem:[#allocation10 + $0x308] sm:$0xff] }
 0x193   :  { %1113 = vmatpush1.bf16.msra.mxu0 %v4614_v25  ;;  %1195 = vmatpush1.bf16.msra.mxu1 %v4617_v39  ;;  %v4013_v25 = vcombine.low %v1256_v29, %v1260_v30  ;;  %v4020_v39 = vcombine.high %v1263_v35, %v1267_v16  ;;  %v1316_v30 = vld [vmem:[#allocation10 + $0x328] sm:$0xff]  ;;  %v1323_v35 = vld [vmem:[#allocation10 + $0x360] sm:$0xff] }
 0x194   :  { %1114 = vmatprep.subr.bf16.mxu0 %v4622_v40  ;;  %1196 = vmatprep.subr.bf16.mxu1 %v4625_v41  ;;  %v4022_v40 = vcombine.high %v1264_v36, %v1268_v37  ;;  %v1271_v41 = vld [vmem:[#allocation10 + $0x1c0] sm:$0xff]  ;;  %v1320_v16 = vld [vmem:[#allocation10 + $0x348] sm:$0xff] }
 0x195   :  { %v4027_v53 = vcombine.low %v1271_v41, %v1275_v42 }
 0x197   :  { %1115 = vmatpush1.bf16.msra.mxu0 %v4620_v46  ;;  %1197 = vmatpush1.bf16.msra.mxu1 %v4623_v47  ;;  %v4021_v46 = vcombine.low %v1264_v36, %v1268_v37  ;;  %v4028_v47 = vcombine.high %v1271_v41, %v1275_v42  ;;  %v1324_v37 = vld [vmem:[#allocation10 + $0x368] sm:$0xff]  ;;  %v1331_v41 = vld [vmem:[#allocation10 + $0x3a0] sm:$0xff] }
 0x198   :  { %2793 = vmatprep.subr.bf16.mxu0 %v3972_v48  ;;  %2875 = vmatprep.subr.bf16.mxu1 %v3974_v49  ;;  %v4030_v48 = vcombine.high %v1272_v43, %v1276_v44  ;;  %v1279_v49 = vld [vmem:[#allocation10 + $0x200] sm:$0xff]  ;;  %v1328_v42 = vld [vmem:[#allocation10 + $0x388] sm:$0xff] }
 0x199   :  { %v4035_v61 = vcombine.low %v1279_v49, %v1283_v50  ;;  %v1332_v44 = vld [vmem:[#allocation10 + $0x3a8] sm:$0xff] }
 0x19a   :  { %1117 = vmatmul.mubr.bf16.vlgmr.msra.gmra.mrb[4].mxu0 %v251_v57  ;;  %1199 = vmatmul.mubr.bf16.vlgmr.msra.gmra.mrb[4].mxu1 %v251_v57  ;;  %v1287_v57 = vld [vmem:[#allocation10 + $0x240] sm:$0xff] }
 0x19b   :  { %2794 = vmatpush1.bf16.msra.mxu0 %v3971_v55  ;;  %2876 = vmatpush1.bf16.msra.mxu1 %v3973_v56  ;;  %v4036_v55 = vcombine.high %v1279_v49, %v1283_v50  ;;  %v4038_v56 = vcombine.high %v1280_v51, %v1284_v52  ;;  %v1339_v49 = vld [vmem:[#allocation10 + $0x3e0] sm:$0xff]  ;;  %v1336_v50 = vld [vmem:[#allocation10 + $0x3c8] sm:$0xff] }
 0x19c   :  { %2795 = vmatprep.subr.bf16.mxu0 %v3980_v58  ;;  %2877 = vmatprep.subr.bf16.mxu1 %v3982_v59  ;;  %v1291_v58 = vld [vmem:[#allocation10 + $0x260] sm:$0xff]  ;;  %v1288_v59 = vld [vmem:[#allocation10 + $0x248] sm:$0xff] }
 0x19d   :  { %v4044_v63 = vcombine.high %v1287_v57, %v1291_v58  ;;  %v4043_v5 = vcombine.low %v1287_v57, %v1291_v58  ;;  %v4045_v6 = vcombine.low %v1288_v59, %v1292_v60  ;;  %v1340_v52 = vld [vmem:[#allocation10 + $0x3e8] sm:$0xff]  ;;  %v1347_v57 = vld [vmem:[#allocation10 + $0x420] sm:$0xff] }
 0x19e   :  { %v1344_v58 = vld [vmem:[#allocation10 + $0x408] sm:$0xff] }
 0x19f   :  { %2796 = vmatpush1.bf16.msra.mxu0 %v3979_v0  ;;  %2878 = vmatpush1.bf16.msra.mxu1 %v3981_v1  ;;  %v4046_v0 = vcombine.high %v1288_v59, %v1292_v60  ;;  %v1295_v1 = vld [vmem:[#allocation10 + $0x280] sm:$0xff]  ;;  %v1348_v60 = vld [vmem:[#allocation10 + $0x428] sm:$0xff] }
 0x1a0   :  { %2797 = vmatprep.subr.bf16.mxu0 %v3988_v2  ;;  %2879 = vmatprep.subr.bf16.mxu1 %v3990_v3  ;;  %v1299_v2 = vld [vmem:[#allocation10 + $0x2a0] sm:$0xff]  ;;  %v1296_v3 = vld [vmem:[#allocation10 + $0x288] sm:$0xff] }
 0x1a1   :  { %v4052_v7 = vcombine.high %v1295_v1, %v1299_v2  ;;  %v4051_v13 = vcombine.low %v1295_v1, %v1299_v2  ;;  %v4053_v19 = vcombine.low %v1296_v3, %v1300_v4 }
 0x1a3   :  { %2798 = vmatpush1.bf16.msra.mxu0 %v3987_v8  ;;  %2880 = vmatpush1.bf16.msra.mxu1 %v3989_v9  ;;  %v4054_v8 = vcombine.high %v1296_v3, %v1300_v4  ;;  %v1303_v9 = vld [vmem:[#allocation10 + $0x2c0] sm:$0xff] }
 0x1a4   :  { %2799 = vmatprep.subr.bf16.mxu0 %v3996_v10  ;;  %2881 = vmatprep.subr.bf16.mxu1 %v3998_v11  ;;  %v1307_v10 = vld [vmem:[#allocation10 + $0x2e0] sm:$0xff]  ;;  %v1304_v11 = vld [vmem:[#allocation10 + $0x2c8] sm:$0xff] }
 0x1a5   :  { %v4060_v20 = vcombine.high %v1303_v9, %v1307_v10 }
 0x1a7   :  { %2800 = vmatpush1.bf16.msra.mxu0 %v3995_v21  ;;  %2882 = vmatpush1.bf16.msra.mxu1 %v3997_v23  ;;  %v4062_v21 = vcombine.high %v1304_v11, %v1308_v12  ;;  %v4059_v23 = vcombine.low %v1303_v9, %v1307_v10 }
 0x1a8   :  { %2801 = vmatprep.subr.bf16.mxu0 %v4004_v24  ;;  %2883 = vmatprep.subr.bf16.mxu1 %v4006_v26  ;;  %v4061_v24 = vcombine.low %v1304_v11, %v1308_v12  ;;  %v1311_v26 = vld [vmem:[#allocation10 + $0x300] sm:$0xff] }
 0x1a9   :  { %v4068_v29 = vcombine.high %v1311_v26, %v1315_v27 }
 0x1ab   :  { %2802 = vmatpush1.bf16.msra.mxu0 %v4003_v31  ;;  %2884 = vmatpush1.bf16.msra.mxu1 %v4005_v32  ;;  %v4067_v31 = vcombine.low %v1311_v26, %v1315_v27  ;;  %v4069_v32 = vcombine.low %v1312_v28, %v1316_v30  ;;  %v1352_v26 = vld [vmem:[#allocation10 + $0x448] sm:$0xff] }
 0x1ac   :  { %2803 = vmatprep.subr.bf16.mxu0 %v4012_v33  ;;  %2885 = vmatprep.subr.bf16.mxu1 %v4014_v34  ;;  %v4070_v33 = vcombine.high %v1312_v28, %v1316_v30  ;;  %v1319_v34 = vld [vmem:[#allocation10 + $0x340] sm:$0xff]  ;;  %v1356_v27 = vld [vmem:[#allocation10 + $0x468] sm:$0xff] }
 0x1ad   :  { %v4076_v36 = vcombine.high %v1319_v34, %v1323_v35 }
 0x1af   :  { %2804 = vmatpush1.bf16.msra.mxu0 %v4011_v38  ;;  %2886 = vmatpush1.bf16.msra.mxu1 %v4013_v25  ;;  %v4075_v38 = vcombine.low %v1319_v34, %v1323_v35  ;;  %v4077_v25 = vcombine.low %v1320_v16, %v1324_v37  ;;  %v1363_v34 = vld [vmem:[#allocation10 + $0x4a0] sm:$0xff]  ;;  %v1360_v35 = vld [vmem:[#allocation10 + $0x488] sm:$0xff] }
 0x1b0   :  { %2805 = vmatprep.subr.bf16.mxu0 %v4020_v39  ;;  %2887 = vmatprep.subr.bf16.mxu1 %v4022_v40  ;;  %v4078_v39 = vcombine.high %v1320_v16, %v1324_v37  ;;  %v1327_v40 = vld [vmem:[#allocation10 + $0x380] sm:$0xff]  ;;  %v1364_v16 = vld [vmem:[#allocation10 + $0x4a8] sm:$0xff] }
 0x1b1   :  { %v4084_v43 = vcombine.high %v1327_v40, %v1331_v41 }
 0x1b3   :  { %2806 = vmatpush1.bf16.msra.mxu0 %v4019_v45  ;;  %2888 = vmatpush1.bf16.msra.mxu1 %v4021_v46  ;;  %v4083_v45 = vcombine.low %v1327_v40, %v1331_v41  ;;  %v4085_v46 = vcombine.low %v1328_v42, %v1332_v44  ;;  %v1367_v40 = vld [vmem:[#allocation10 + $0x4c0] sm:$0xff] }
 0x1b4   :  { %2807 = vmatprep.subr.bf16.mxu0 %v4028_v47  ;;  %2889 = vmatprep.subr.bf16.mxu1 %v4030_v48  ;;  %v4086_v47 = vcombine.high %v1328_v42, %v1332_v44  ;;  %v1335_v48 = vld [vmem:[#allocation10 + $0x3c0] sm:$0xff]  ;;  %v1368_v42 = vld [vmem:[#allocation10 + $0x4c8] sm:$0xff] }
 0x1b5   :  { %v4092_v51 = vcombine.high %v1335_v48, %v1339_v49  ;;  %v1371_v41 = vld [vmem:[#allocation10 + $0x4e0] sm:$0xff] }
 0x1b7   :  { %2808 = vmatpush1.bf16.msra.mxu0 %v4027_v53  ;;  %2890 = vmatpush1.bf16.msra.mxu1 %v4029_v54  ;;  %v4091_v53 = vcombine.low %v1335_v48, %v1339_v49  ;;  %v4093_v54 = vcombine.low %v1336_v50, %v1340_v52  ;;  %v1375_v48 = vld [vmem:[#allocation10 + $0x500] sm:$0xff] }
 0x1b8   :  { %2809 = vmatprep.subr.bf16.mxu0 %v4036_v55  ;;  %2891 = vmatprep.subr.bf16.mxu1 %v4038_v56  ;;  %v4094_v55 = vcombine.high %v1336_v50, %v1340_v52  ;;  %v1343_v56 = vld [vmem:[#allocation10 + $0x400] sm:$0xff]  ;;  %v1376_v50 = vld [vmem:[#allocation10 + $0x508] sm:$0xff]  ;;  %v4123_v52 = vcombine.low %v1367_v40, %v1371_v41 }
 0x1b9   :  { %v4100_v59 = vcombine.high %v1343_v56, %v1347_v57  ;;  %v1379_v49 = vld [vmem:[#allocation10 + $0x520] sm:$0xff] }
 0x1bb   :  { %2810 = vmatpush1.bf16.msra.mxu0 %v4035_v61  ;;  %2892 = vmatpush1.bf16.msra.mxu1 %v4037_v62  ;;  %v4099_v61 = vcombine.low %v1343_v56, %v1347_v57  ;;  %v4101_v62 = vcombine.low %v1344_v58, %v1348_v60  ;;  %v1383_v56 = vld [vmem:[#allocation10 + $0x540] sm:$0xff] }
 0x1bc   :  { %2811 = vmatprep.subr.bf16.mxu0 %v4044_v63  ;;  %2893 = vmatprep.subr.bf16.mxu1 %v4046_v0  ;;  %v4102_v63 = vcombine.high %v1344_v58, %v1348_v60  ;;  %v5059_v0 = vld [vmem:[#allocation8] sm:$0xf]  ;;  %v1387_v57 = vld [vmem:[#allocation10 + $0x560] sm:$0xff]  ;;  %v1384_v58 = vld [vmem:[#allocation10 + $0x548] sm:$0xff]  ;;  %v4131_v60 = vcombine.low %v1375_v48, %v1379_v49 }
 0x1bd   :  { %v386_v1 = vrot.slane %v5059_v0, %v5032_v15  ;;  %v390_v2 = vrot.slane %v5059_v0, %v5040_v17  ;;  %v398_v3 = vrot.slane %v5059_v0, %v5043_v18 }
 0x1bf   :  { %2812 = vmatpush1.bf16.msra.mxu0 %v4043_v5  ;;  %2894 = vmatpush1.bf16.msra.mxu1 %v4045_v6 }
 0x1c0   :  { %2813 = vmatprep.subr.bf16.mxu0 %v4052_v7  ;;  %2895 = vmatprep.subr.bf16.mxu1 %v4054_v8 }
 0x1c3   :  { %2814 = vmatpush1.bf16.msra.mxu0 %v4051_v13  ;;  %2896 = vmatpush1.bf16.msra.mxu1 %v4053_v19 }
 0x1c4   :  { %2815 = vmatprep.subr.bf16.mxu0 %v4060_v20  ;;  %2897 = vmatprep.subr.bf16.mxu1 %v4062_v21  ;;  %v1351_v21 = vld [vmem:[#allocation10 + $0x440] sm:$0xff] }
 0x1c7   :  { %2816 = vmatpush1.bf16.msra.mxu0 %v4059_v23  ;;  %2898 = vmatpush1.bf16.msra.mxu1 %v4061_v24  ;;  %v1355_v24 = vld [vmem:[#allocation10 + $0x460] sm:$0xff] }
 0x1c8   :  { %2817 = vmatprep.subr.bf16.mxu0 %v4068_v29  ;;  %2899 = vmatprep.subr.bf16.mxu1 %v4070_v33  ;;  %v4110_v33 = vcombine.high %v1352_v26, %v1356_v27  ;;  %v4107_v37 = vcombine.low %v1351_v21, %v1355_v24 }
 0x1cb   :  { %2818 = vmatpush1.bf16.msra.mxu0 %v4067_v31  ;;  %2900 = vmatpush1.bf16.msra.mxu1 %v4069_v32  ;;  %v1359_v31 = vld [vmem:[#allocation10 + $0x480] sm:$0xff]  ;;  %v4108_v32 = vcombine.high %v1351_v21, %v1355_v24 }
 0x1cc   :  { %2819 = vmatprep.subr.bf16.mxu0 %v4076_v36  ;;  %2901 = vmatprep.subr.bf16.mxu1 %v4078_v39  ;;  %v4118_v39 = vcombine.high %v1360_v35, %v1364_v16  ;;  %v4115_v44 = vcombine.low %v1359_v31, %v1363_v34  ;;  %v1407_v24 = vld [vmem:[#allocation10 + $0x600] sm:$0xff] }
 0x1cf   :  { %2820 = vmatpush1.bf16.msra.mxu0 %v4075_v38  ;;  %2902 = vmatpush1.bf16.msra.mxu1 %v4077_v25  ;;  %v4109_v38 = vcombine.low %v1352_v26, %v1356_v27  ;;  %v4116_v25 = vcombine.high %v1359_v31, %v1363_v34  ;;  %v1411_v26 = vld [vmem:[#allocation10 + $0x620] sm:$0xff]  ;;  %v1408_v27 = vld [vmem:[#allocation10 + $0x608] sm:$0xff] }
 0x1d0   :  { %2821 = vmatprep.subr.bf16.mxu0 %v4084_v43  ;;  %2903 = vmatprep.subr.bf16.mxu1 %v4086_v47  ;;  %v1372_v43 = vld [vmem:[#allocation10 + $0x4e8] sm:$0xff] }
 0x1d1   :  { %v4126_v47 = vcombine.high %v1368_v42, %v1372_v43 }
 0x1d3   :  { %2822 = vmatpush1.bf16.msra.mxu0 %v4083_v45  ;;  %2904 = vmatpush1.bf16.msra.mxu1 %v4085_v46  ;;  %v4117_v45 = vcombine.low %v1360_v35, %v1364_v16  ;;  %v4124_v46 = vcombine.high %v1367_v40, %v1371_v41  ;;  %v1415_v35 = vld [vmem:[#allocation10 + $0x640] sm:$0xff] }
 0x1d4   :  { %2823 = vmatprep.subr.bf16.mxu0 %v4092_v51  ;;  %2905 = vmatprep.subr.bf16.mxu1 %v4094_v55  ;;  %v1380_v51 = vld [vmem:[#allocation10 + $0x528] sm:$0xff]  ;;  %v1419_v16 = vld [vmem:[#allocation10 + $0x660] sm:$0xff] }
 0x1d5   :  { %v4134_v55 = vcombine.high %v1376_v50, %v1380_v51  ;;  %v4172_v40 = vcombine.high %v1415_v35, %v1419_v16 }
 0x1d7   :  { %2824 = vmatpush1.bf16.msra.mxu0 %v4091_v53  ;;  %2906 = vmatpush1.bf16.msra.mxu1 %v4093_v54  ;;  %v4125_v53 = vcombine.low %v1368_v42, %v1372_v43  ;;  %v4132_v54 = vcombine.high %v1375_v48, %v1379_v49  ;;  %v1423_v42 = vld [vmem:[#allocation10 + $0x680] sm:$0xff] }
 0x1d8   :  { %2834 = vmatprep.subr.bf16.mxu0 %v4100_v59  ;;  %2916 = vmatprep.subr.bf16.mxu1 %v4102_v63  ;;  %v1388_v59 = vld [vmem:[#allocation10 + $0x568] sm:$0xff]  ;;  %v1427_v43 = vld [vmem:[#allocation10 + $0x6a0] sm:$0xff] }
 0x1d9   :  { %v4142_v63 = vcombine.high %v1384_v58, %v1388_v59  ;;  %v4180_v48 = vcombine.high %v1423_v42, %v1427_v43 }
 0x26d   :  { %v1118_v4 = vpop.f32.mrb[4].mxu0  ;;  %v5067_v5 = vpop.f32.mrb[4].mxu1 }
 0x26e   :  { %v4380_v6 = vadd.f32 %v1118_v4, %v386_v1  ;;  %v1120_v7 = vpop.f32.mrb[5].mxu0  ;;  %v1202_v8 = vpop.f32.mrb[5].mxu1  ;;  %v1391_v1 = vld [vmem:[#allocation10 + $0x580] sm:$0xff]  ;;  %v1396_v4 = vld [vmem:[#allocation10 + $0x5a8] sm:$0xff] }
 0x26f   :  { %v4381_v9 = vadd.f32 %v1120_v7, %v390_v2  ;;  %v4383_v10 = vadd.f32 %v1202_v8, %v398_v3  ;;  %v1122_v11 = vpop.f32.mrb[6].mxu0  ;;  %v1204_v12 = vpop.f32.mrb[6].mxu1  ;;  %v1395_v2 = vld [vmem:[#allocation10 + $0x5a0] sm:$0xff]  ;;  %v1392_v3 = vld [vmem:[#allocation10 + $0x588] sm:$0xff]  ;;  %v4141_v7 = vcombine.low %v1384_v58, %v1388_v59 }
 0x270   :  { %v1123_v13 = vpop.f32.mrb[7].mxu0  ;;  %v1205_v19 = vpop.f32.mrb[7].mxu1  ;;  %4698 = vtanh.f32 %v4380_v6  ;;  %v4139_v6 = vcombine.low %v1383_v56, %v1387_v57  ;;  %v4148_v8 = vcombine.high %v1391_v1, %v1395_v2  ;;  %v1403_v11 = vld [vmem:[#allocation10 + $0x5e0] sm:$0xff]  ;;  %v1400_v12 = vld [vmem:[#allocation10 + $0x5c8] sm:$0xff] }
 0x271   :  { %4700 = vtanh.f32 %v4381_v9  ;;  %v4150_v9 = vcombine.high %v1392_v3, %v1396_v4  ;;  %v1404_v13 = vld [vmem:[#allocation10 + $0x5e8] sm:$0xff]  ;;  %v4147_v19 = vcombine.low %v1391_v1, %v1395_v2  ;;  %v1439_v58 = vld [vmem:[#allocation10 + $0x700] sm:$0xff] }
 0x272   :  { %4702 = vtanh.f32 %v4383_v10  ;;  %v1399_v10 = vld [vmem:[#allocation10 + $0x5c0] sm:$0xff] }
 0x273   :  { %v4156_v21 = vcombine.high %v1399_v10, %v1403_v11  ;;  %v4155_v31 = vcombine.low %v1399_v10, %v1403_v11  ;;  %v1443_v59 = vld [vmem:[#allocation10 + $0x720] sm:$0xff] }
 0x274   :  { %v4196_v2 = vcombine.high %v1439_v58, %v1443_v59  ;;  %v4195_v10 = vcombine.low %v1439_v58, %v1443_v59 }
 0x27a   :  { %v4699_v20 = vpop.eup %4698 }
 0x27b   :  { %v4701_v23 = vpop.eup %4700  ;;  %v5071_v30 = vpack.c.bf16 %v4699_v20, %v4699_v20  ;;  %v4149_v20 = vcombine.low %v1392_v3, %v1396_v4  ;;  %v1447_v4 = vld [vmem:[#allocation10 + $0x740] sm:$0xff] }
 0x27c   :  { %v4703_v28 = vpop.eup %4702  ;;  %v5069_v29 = vpack.c.bf16 %v4701_v23, %v4701_v23  ;;  %v4158_v23 = vcombine.high %v1400_v12, %v1404_v13 }
 0x27d   :  { %v5075_v36 = vpack.c.bf16 %v4703_v28, %v4703_v28  ;;  %v1412_v28 = vld [vmem:[#allocation10 + $0x628] sm:$0xff] }
 0x27e   :  { %2825 = vmatprep.mubr.bf16.mxu0 %v5069_v29  ;;  %2907 = vmatprep.mubr.bf16.mxu1 %v5069_v29  ;;  %v4166_v34 = vcombine.high %v1408_v27, %v1412_v28 }
 0x27f   :  { %2826 = vmatmul.mubr.bf16.vlgmr.msra.gmra.mrb[8].mxu0 %v5071_v30  ;;  %2908 = vmatmul.mubr.bf16.vlgmr.msra.gmra.mrb[8].mxu1 %v5071_v30 }
 0x280   :  { %2835 = vmatpush1.bf16.msra.mxu0 %v4099_v61  ;;  %2917 = vmatpush1.bf16.msra.mxu1 %v4101_v62  ;;  %v4133_v61 = vcombine.low %v1376_v50, %v1380_v51  ;;  %v4140_v62 = vcombine.high %v1383_v56, %v1387_v57  ;;  %v1431_v50 = vld [vmem:[#allocation10 + $0x6c0] sm:$0xff] }
 0x281   :  { %2866 = vmatprep.mubr.bf16.mxu0 %v5075_v36  ;;  %2948 = vmatprep.mubr.bf16.mxu1 %v5075_v36  ;;  %v1435_v51 = vld [vmem:[#allocation10 + $0x6e0] sm:$0xff] }
 0x282   :  { %2836 = vmatprep.subr.bf16.mxu0 %v4108_v32  ;;  %2918 = vmatprep.subr.bf16.mxu1 %v4110_v33  ;;  %v4157_v32 = vcombine.low %v1400_v12, %v1404_v13  ;;  %v4164_v33 = vcombine.high %v1407_v24, %v1411_v26  ;;  %v4188_v56 = vcombine.high %v1431_v50, %v1435_v51  ;;  %v1455_v13 = vld [vmem:[#allocation10 + $0x780] sm:$0xff] }
 0x284   :  { %2837 = vmatpush1.bf16.msra.mxu0 %v4107_v37  ;;  %2919 = vmatpush1.bf16.msra.mxu1 %v4109_v38  ;;  %v1416_v37 = vld [vmem:[#allocation10 + $0x648] sm:$0xff] }
 0x285   :  { %2838 = vmatprep.subr.bf16.mxu0 %v4116_v25  ;;  %2920 = vmatprep.subr.bf16.mxu1 %v4118_v39  ;;  %v1420_v38 = vld [vmem:[#allocation10 + $0x668] sm:$0xff]  ;;  %v4163_v25 = vcombine.low %v1407_v24, %v1411_v26  ;;  %v4165_v39 = vcombine.low %v1408_v27, %v1412_v28  ;;  %v1463_v27 = vld [vmem:[#allocation10 + $0x7c0] sm:$0xff] }
 0x286   :  { %v4174_v41 = vcombine.high %v1416_v37, %v1420_v38  ;;  %v1467_v28 = vld [vmem:[#allocation10 + $0x7e0] sm:$0xff] }
 0x288   :  { %2839 = vmatpush1.bf16.msra.mxu0 %v4115_v44  ;;  %2921 = vmatpush1.bf16.msra.mxu1 %v4117_v45  ;;  %v1424_v44 = vld [vmem:[#allocation10 + $0x688] sm:$0xff] }
 0x289   :  { %2840 = vmatprep.subr.bf16.mxu0 %v4124_v46  ;;  %2922 = vmatprep.subr.bf16.mxu1 %v4126_v47  ;;  %v1428_v45 = vld [vmem:[#allocation10 + $0x6a8] sm:$0xff]  ;;  %v4171_v46 = vcombine.low %v1415_v35, %v1419_v16  ;;  %v4173_v47 = vcombine.low %v1416_v37, %v1420_v38  ;;  %v4220_v35 = vcombine.high %v1463_v27, %v1467_v28  ;;  %v1217_v37 = vld [vmem:[#allocation10 + $0x10] sm:$0xff] }
 0x28a   :  { %v4182_v49 = vcombine.high %v1424_v44, %v1428_v45  ;;  %v1221_v38 = vld [vmem:[#allocation10 + $0x30] sm:$0xff] }
 0x28c   :  { %2841 = vmatpush1.bf16.msra.mxu0 %v4123_v52  ;;  %2923 = vmatpush1.bf16.msra.mxu1 %v4125_v53  ;;  %v1432_v52 = vld [vmem:[#allocation10 + $0x6c8] sm:$0xff] }
 0x28d   :  { %2842 = vmatprep.subr.bf16.mxu0 %v4132_v54  ;;  %2924 = vmatprep.subr.bf16.mxu1 %v4134_v55  ;;  %v1436_v53 = vld [vmem:[#allocation10 + $0x6e8] sm:$0xff]  ;;  %v4179_v54 = vcombine.low %v1423_v42, %v1427_v43  ;;  %v4181_v55 = vcombine.low %v1424_v44, %v1428_v45  ;;  %v3976_v42 = vcombine.high %v1217_v37, %v1221_v38  ;;  %v1225_v45 = vld [vmem:[#allocation10 + $0x50] sm:$0xff] }
 0x28e   :  { %v4190_v57 = vcombine.high %v1432_v52, %v1436_v53  ;;  %v4189_v1 = vcombine.low %v1432_v52, %v1436_v53 }
 0x290   :  { %2843 = vmatpush1.bf16.msra.mxu0 %v4131_v60  ;;  %2925 = vmatpush1.bf16.msra.mxu1 %v4133_v61  ;;  %v1440_v60 = vld [vmem:[#allocation10 + $0x708] sm:$0xff] }
 0x291   :  { %2844 = vmatprep.subr.bf16.mxu0 %v4140_v62  ;;  %2926 = vmatprep.subr.bf16.mxu1 %v4142_v63  ;;  %v1444_v61 = vld [vmem:[#allocation10 + $0x728] sm:$0xff]  ;;  %v394_v62 = vrot.slane %v5059_v0, %v5054_v22  ;;  %v4187_v63 = vcombine.low %v1431_v50, %v1435_v51 }
 0x292   :  { %v4198_v3 = vcombine.high %v1440_v60, %v1444_v61  ;;  %v4197_v11 = vcombine.low %v1440_v60, %v1444_v61 }
 0x294   :  { %2845 = vmatpush1.bf16.msra.mxu0 %v4139_v6  ;;  %2927 = vmatpush1.bf16.msra.mxu1 %v4141_v7  ;;  %v1451_v6 = vld [vmem:[#allocation10 + $0x760] sm:$0xff]  ;;  %v1448_v7 = vld [vmem:[#allocation10 + $0x748] sm:$0xff] }
 0x295   :  { %2846 = vmatprep.subr.bf16.mxu0 %v4148_v8  ;;  %2928 = vmatprep.subr.bf16.mxu1 %v4150_v9  ;;  %v1452_v8 = vld [vmem:[#allocation10 + $0x768] sm:$0xff]  ;;  %v4382_v9 = vadd.f32 %v5067_v5, %v394_v62  ;;  %v4204_v0 = vcombine.high %v1447_v4, %v1451_v6  ;;  %v1241_v62 = vld [vmem:[#allocation10 + $0xd0] sm:$0xff] }
 0x296   :  { %v4206_v12 = vcombine.high %v1448_v7, %v1452_v8  ;;  %v4205_v24 = vcombine.low %v1448_v7, %v1452_v8  ;;  %v1249_v8 = vld [vmem:[#allocation10 + $0x110] sm:$0xff] }
 0x297   :  { %4704 = vtanh.f32 %v4382_v9  ;;  %v1253_v9 = vld [vmem:[#allocation10 + $0x130] sm:$0xff] }
 0x298   :  { %2847 = vmatpush1.bf16.msra.mxu0 %v4147_v19  ;;  %2929 = vmatpush1.bf16.msra.mxu1 %v4149_v20  ;;  %v1459_v19 = vld [vmem:[#allocation10 + $0x7a0] sm:$0xff]  ;;  %v1456_v20 = vld [vmem:[#allocation10 + $0x788] sm:$0xff] }
 0x299   :  { %2848 = vmatprep.subr.bf16.mxu0 %v4156_v21  ;;  %2930 = vmatprep.subr.bf16.mxu1 %v4158_v23  ;;  %v1460_v21 = vld [vmem:[#allocation10 + $0x7a8] sm:$0xff]  ;;  %v4203_v23 = vcombine.low %v1447_v4, %v1451_v6  ;;  %v4212_v5 = vcombine.high %v1455_v13, %v1459_v19 }
 0x29a   :  { %v4214_v26 = vcombine.high %v1456_v20, %v1460_v21 }
 0x29c   :  { %2849 = vmatpush1.bf16.msra.mxu0 %v4155_v31  ;;  %2931 = vmatpush1.bf16.msra.mxu1 %v4157_v32  ;;  %v1464_v31 = vld [vmem:[#allocation10 + $0x7c8] sm:$0xff] }
 0x29d   :  { %2850 = vmatprep.subr.bf16.mxu0 %v4164_v33  ;;  %2932 = vmatprep.subr.bf16.mxu1 %v4166_v34  ;;  %v1468_v32 = vld [vmem:[#allocation10 + $0x7e8] sm:$0xff]  ;;  %v4211_v33 = vcombine.low %v1455_v13, %v1459_v19  ;;  %v4213_v34 = vcombine.low %v1456_v20, %v1460_v21  ;;  %v1257_v19 = vld [vmem:[#allocation10 + $0x150] sm:$0xff]  ;;  %v1258_v21 = vld [vmem:[#allocation10 + $0x158] sm:$0xff] }
 0x29e   :  { %v4222_v16 = vcombine.high %v1464_v31, %v1468_v32  ;;  %v1261_v20 = vld [vmem:[#allocation10 + $0x170] sm:$0xff] }
 0x2a0   :  { %2851 = vmatpush1.bf16.msra.mxu0 %v4163_v25  ;;  %2933 = vmatpush1.bf16.msra.mxu1 %v4165_v39  ;;  %v1218_v25 = vld [vmem:[#allocation10 + $0x18] sm:$0xff] }
 0x2a1   :  { %2852 = vmatprep.subr.bf16.mxu0 %v4172_v40  ;;  %2934 = vmatprep.subr.bf16.mxu1 %v4174_v41  ;;  %v1222_v39 = vld [vmem:[#allocation10 + $0x38] sm:$0xff]  ;;  %v4219_v40 = vcombine.low %v1463_v27, %v1467_v28  ;;  %v4221_v41 = vcombine.low %v1464_v31, %v1468_v32  ;;  %v4705_v44 = vpop.eup %4704  ;;  %v1265_v28 = vld [vmem:[#allocation10 + $0x190] sm:$0xff] }
 0x2a2   :  { %v3978_v43 = vcombine.high %v1218_v25, %v1222_v39  ;;  %v5084_v50 = vpack.c.bf16 %v4705_v44, %v4705_v44  ;;  %v3977_v51 = vcombine.low %v1218_v25, %v1222_v39  ;;  %v1269_v31 = vld [vmem:[#allocation10 + $0x1b0] sm:$0xff]  ;;  %v1266_v32 = vld [vmem:[#allocation10 + $0x198] sm:$0xff] }
 0x2a3   :  { %v1277_v25 = vld [vmem:[#allocation10 + $0x1f0] sm:$0xff]  ;;  %v1274_v39 = vld [vmem:[#allocation10 + $0x1d8] sm:$0xff] }
 0x2a4   :  { %2853 = vmatpush1.bf16.msra.mxu0 %v4171_v46  ;;  %2935 = vmatpush1.bf16.msra.mxu1 %v4173_v47  ;;  %v1229_v46 = vld [vmem:[#allocation10 + $0x70] sm:$0xff]  ;;  %v1226_v47 = vld [vmem:[#allocation10 + $0x58] sm:$0xff] }
 0x2a5   :  { %2854 = vmatprep.subr.bf16.mxu0 %v4180_v48  ;;  %2936 = vmatprep.subr.bf16.mxu1 %v4182_v49  ;;  %v1230_v48 = vld [vmem:[#allocation10 + $0x78] sm:$0xff]  ;;  %v3975_v49 = vcombine.low %v1217_v37, %v1221_v38  ;;  %v3984_v52 = vcombine.high %v1225_v45, %v1229_v46  ;;  %v3983_v58 = vcombine.low %v1225_v45, %v1229_v46  ;;  %v1273_v38 = vld [vmem:[#allocation10 + $0x1d0] sm:$0xff] }
 0x2a6   :  { %v3986_v53 = vcombine.high %v1226_v47, %v1230_v48  ;;  %v3985_v59 = vcombine.low %v1226_v47, %v1230_v48  ;;  %v1281_v45 = vld [vmem:[#allocation10 + $0x210] sm:$0xff]  ;;  %v1282_v47 = vld [vmem:[#allocation10 + $0x218] sm:$0xff] }
 0x2a7   :  { %v1285_v46 = vld [vmem:[#allocation10 + $0x230] sm:$0xff]  ;;  %v1286_v48 = vld [vmem:[#allocation10 + $0x238] sm:$0xff] }
 0x2a8   :  { %2855 = vmatpush1.bf16.msra.mxu0 %v4179_v54  ;;  %2937 = vmatpush1.bf16.msra.mxu1 %v4181_v55  ;;  %v1233_v54 = vld [vmem:[#allocation10 + $0x90] sm:$0xff] }
 0x2a9   :  { %2856 = vmatprep.subr.bf16.mxu0 %v4188_v56  ;;  %2938 = vmatprep.subr.bf16.mxu1 %v4190_v57  ;;  %v1237_v55 = vld [vmem:[#allocation10 + $0xb0] sm:$0xff]  ;;  %v1234_v56 = vld [vmem:[#allocation10 + $0x98] sm:$0xff] }
 0x2aa   :  { %v1238_v57 = vld [vmem:[#allocation10 + $0xb8] sm:$0xff]  ;;  %v3992_v60 = vcombine.high %v1233_v54, %v1237_v55 }
 0x2ab   :  { %v3994_v61 = vcombine.high %v1234_v56, %v1238_v57  ;;  %v3993_v4 = vcombine.low %v1234_v56, %v1238_v57  ;;  %v1290_v56 = vld [vmem:[#allocation10 + $0x258] sm:$0xff] }
 0x2ac   :  { %2857 = vmatpush1.bf16.msra.mxu0 %v4187_v63  ;;  %2939 = vmatpush1.bf16.msra.mxu1 %v4189_v1  ;;  %v1245_v63 = vld [vmem:[#allocation10 + $0xf0] sm:$0xff]  ;;  %v1242_v1 = vld [vmem:[#allocation10 + $0xd8] sm:$0xff] }
 0x2ad   :  { %2858 = vmatprep.subr.bf16.mxu0 %v4196_v2  ;;  %2940 = vmatprep.subr.bf16.mxu1 %v4198_v3  ;;  %v1246_v2 = vld [vmem:[#allocation10 + $0xf8] sm:$0xff]  ;;  %v3991_v3 = vcombine.low %v1233_v54, %v1237_v55  ;;  %v4000_v6 = vcombine.high %v1241_v62, %v1245_v63  ;;  %v1289_v54 = vld [vmem:[#allocation10 + $0x250] sm:$0xff] }
 0x2ae   :  { %v4002_v7 = vcombine.high %v1242_v1, %v1246_v2  ;;  %v1293_v55 = vld [vmem:[#allocation10 + $0x270] sm:$0xff]  ;;  %v1294_v57 = vld [vmem:[#allocation10 + $0x278] sm:$0xff] }
 0x2b0   :  { %2859 = vmatpush1.bf16.msra.mxu0 %v4195_v10  ;;  %2941 = vmatpush1.bf16.msra.mxu1 %v4197_v11  ;;  %v1254_v10 = vld [vmem:[#allocation10 + $0x138] sm:$0xff]  ;;  %v3999_v11 = vcombine.low %v1241_v62, %v1245_v63  ;;  %v1297_v62 = vld [vmem:[#allocation10 + $0x290] sm:$0xff] }
 0x2b1   :  { %2860 = vmatprep.subr.bf16.mxu0 %v4204_v0  ;;  %2942 = vmatprep.subr.bf16.mxu1 %v4206_v12  ;;  %v4001_v0 = vcombine.low %v1242_v1, %v1246_v2  ;;  %v4008_v12 = vcombine.high %v1249_v8, %v1253_v9  ;;  %v1301_v63 = vld [vmem:[#allocation10 + $0x2b0] sm:$0xff]  ;;  %v1298_v1 = vld [vmem:[#allocation10 + $0x298] sm:$0xff] }
 0x2b2   :  { %v1302_v2 = vld [vmem:[#allocation10 + $0x2b8] sm:$0xff] }
 0x2b4   :  { %2861 = vmatpush1.bf16.msra.mxu0 %v4203_v23  ;;  %2943 = vmatpush1.bf16.msra.mxu1 %v4205_v24  ;;  %v1262_v23 = vld [vmem:[#allocation10 + $0x178] sm:$0xff]  ;;  %v4007_v24 = vcombine.low %v1249_v8, %v1253_v9  ;;  %v1305_v8 = vld [vmem:[#allocation10 + $0x2d0] sm:$0xff] }
 0x2b5   :  { %2862 = vmatprep.subr.bf16.mxu0 %v4212_v5  ;;  %2944 = vmatprep.subr.bf16.mxu1 %v4214_v26  ;;  %v4016_v26 = vcombine.high %v1257_v19, %v1261_v20  ;;  %v4018_v27 = vcombine.high %v1258_v21, %v1262_v23  ;;  %v1309_v9 = vld [vmem:[#allocation10 + $0x2f0] sm:$0xff] }
 0x2b8   :  { %2863 = vmatpush1.bf16.msra.mxu0 %v4211_v33  ;;  %2945 = vmatpush1.bf16.msra.mxu1 %v4213_v34  ;;  %v1270_v33 = vld [vmem:[#allocation10 + $0x1b8] sm:$0xff]  ;;  %v4015_v34 = vcombine.low %v1257_v19, %v1261_v20  ;;  %v1313_v19 = vld [vmem:[#allocation10 + $0x310] sm:$0xff] }
 0x2b9   :  { %2864 = vmatprep.subr.bf16.mxu0 %v4220_v35  ;;  %2946 = vmatprep.subr.bf16.mxu1 %v4222_v16  ;;  %v4017_v35 = vcombine.low %v1258_v21, %v1262_v23  ;;  %v4024_v16 = vcombine.high %v1265_v28, %v1269_v31  ;;  %v4026_v37 = vcombine.high %v1266_v32, %v1270_v33  ;;  %v1317_v20 = vld [vmem:[#allocation10 + $0x330] sm:$0xff]  ;;  %v1314_v21 = vld [vmem:[#allocation10 + $0x318] sm:$0xff] }
 0x2ba   :  { %v1318_v23 = vld [vmem:[#allocation10 + $0x338] sm:$0xff] }
 0x2bc   :  { %2865 = vmatpush1.bf16.msra.mxu0 %v4219_v40  ;;  %2947 = vmatpush1.bf16.msra.mxu1 %v4221_v41  ;;  %v1278_v40 = vld [vmem:[#allocation10 + $0x1f8] sm:$0xff]  ;;  %v4023_v41 = vcombine.low %v1265_v28, %v1269_v31  ;;  %v1321_v28 = vld [vmem:[#allocation10 + $0x350] sm:$0xff] }
 0x2bd   :  { %2957 = vmatprep.subr.bf16.mxu0 %v3976_v42  ;;  %3039 = vmatprep.subr.bf16.mxu1 %v3978_v43  ;;  %v4025_v42 = vcombine.low %v1266_v32, %v1270_v33  ;;  %v4032_v43 = vcombine.high %v1273_v38, %v1277_v25  ;;  %v4034_v44 = vcombine.high %v1274_v39, %v1278_v40  ;;  %v1325_v31 = vld [vmem:[#allocation10 + $0x370] sm:$0xff]  ;;  %v1322_v32 = vld [vmem:[#allocation10 + $0x358] sm:$0xff] }
 0x2be   :  { %v1326_v33 = vld [vmem:[#allocation10 + $0x378] sm:$0xff] }
 0x2bf   :  { %2867 = vmatmul.mubr.bf16.vlgmr.msra.gmra.mrb[8].mxu0 %v5084_v50  ;;  %2949 = vmatmul.mubr.bf16.vlgmr.msra.gmra.mrb[8].mxu1 %v5084_v50 }
 0x2c0   :  { %2958 = vmatpush1.bf16.msra.mxu0 %v3975_v49  ;;  %2989 = vmatprep.mubr.bf16.mxu0 %v5069_v29  ;;  %v4031_v49 = vcombine.low %v1273_v38, %v1277_v25  ;;  %v1329_v38 = vld [vmem:[#allocation10 + $0x390] sm:$0xff] }
 0x2c1   :  { %3040 = vmatpush1.bf16.msra.mxu1 %v3977_v51  ;;  %3071 = vmatprep.mubr.bf16.mxu1 %v5069_v29  ;;  %v1250_v29 = vld [vmem:[#allocation10 + $0x118] sm:$0xff]  ;;  %v4033_v51 = vcombine.low %v1274_v39, %v1278_v40  ;;  %v1333_v25 = vld [vmem:[#allocation10 + $0x3b0] sm:$0xff] }
 0x2c2   :  { %2959 = vmatprep.subr.bf16.mxu0 %v3984_v52  ;;  %3041 = vmatprep.subr.bf16.mxu1 %v3986_v53  ;;  %v4010_v13 = vcombine.high %v1250_v29, %v1254_v10  ;;  %v4009_v5 = vcombine.low %v1250_v29, %v1254_v10  ;;  %v4040_v52 = vcombine.high %v1281_v45, %v1285_v46  ;;  %v1306_v29 = vld [vmem:[#allocation10 + $0x2d8] sm:$0xff] }
 0x2c3   :  { %v4042_v53 = vcombine.high %v1282_v47, %v1286_v48  ;;  %v1310_v10 = vld [vmem:[#allocation10 + $0x2f8] sm:$0xff] }
 0x2c4   :  { %2960 = vmatpush1.bf16.msra.mxu0 %v3983_v58  ;;  %v4039_v58 = vcombine.low %v1281_v45, %v1285_v46  ;;  %v1330_v39 = vld [vmem:[#allocation10 + $0x398] sm:$0xff]  ;;  %v1337_v45 = vld [vmem:[#allocation10 + $0x3d0] sm:$0xff] }
 0x2c5   :  { %3042 = vmatpush1.bf16.msra.mxu1 %v3985_v59  ;;  %2961 = vmatprep.subr.bf16.mxu0 %v3992_v60  ;;  %v4041_v59 = vcombine.low %v1282_v47, %v1286_v48  ;;  %v4048_v60 = vcombine.high %v1289_v54, %v1293_v55  ;;  %v1334_v40 = vld [vmem:[#allocation10 + $0x3b8] sm:$0xff]  ;;  %v1341_v46 = vld [vmem:[#allocation10 + $0x3f0] sm:$0xff] }
 0x2c6   :  { %3043 = vmatprep.subr.bf16.mxu1 %v3994_v61  ;;  %v4050_v61 = vcombine.high %v1290_v56, %v1294_v57  ;;  %v1338_v47 = vld [vmem:[#allocation10 + $0x3d8] sm:$0xff] }
 0x2c7   :  { %v1342_v48 = vld [vmem:[#allocation10 + $0x3f8] sm:$0xff] }
 0x2c8   :  { %2962 = vmatpush1.bf16.msra.mxu0 %v3991_v3  ;;  %v4047_v3 = vcombine.low %v1289_v54, %v1293_v55  ;;  %v1345_v54 = vld [vmem:[#allocation10 + $0x410] sm:$0xff] }
 0x2c9   :  { %3044 = vmatpush1.bf16.msra.mxu1 %v3993_v4  ;;  %2963 = vmatprep.subr.bf16.mxu0 %v4000_v6  ;;  %v4049_v4 = vcombine.low %v1290_v56, %v1294_v57  ;;  %v4056_v6 = vcombine.high %v1297_v62, %v1301_v63  ;;  %v1349_v55 = vld [vmem:[#allocation10 + $0x430] sm:$0xff]  ;;  %v1346_v56 = vld [vmem:[#allocation10 + $0x418] sm:$0xff] }
 0x2ca   :  { %3045 = vmatprep.subr.bf16.mxu1 %v4002_v7  ;;  %v4058_v7 = vcombine.high %v1298_v1, %v1302_v2  ;;  %v1350_v57 = vld [vmem:[#allocation10 + $0x438] sm:$0xff] }
 0x2cc   :  { %2964 = vmatpush1.bf16.msra.mxu0 %v3999_v11  ;;  %v4055_v11 = vcombine.low %v1297_v62, %v1301_v63  ;;  %v1353_v62 = vld [vmem:[#allocation10 + $0x450] sm:$0xff] }
 0x2cd   :  { %3046 = vmatpush1.bf16.msra.mxu1 %v4001_v0  ;;  %2965 = vmatprep.subr.bf16.mxu0 %v4008_v12  ;;  %v4057_v0 = vcombine.low %v1298_v1, %v1302_v2  ;;  %v4064_v12 = vcombine.high %v1305_v8, %v1309_v9  ;;  %v1357_v63 = vld [vmem:[#allocation10 + $0x470] sm:$0xff]  ;;  %v4103_v1 = vcombine.low %v1345_v54, %v1349_v55  ;;  %v1354_v2 = vld [vmem:[#allocation10 + $0x458] sm:$0xff] }
 0x2ce   :  { %3047 = vmatprep.subr.bf16.mxu1 %v4010_v13  ;;  %v4066_v13 = vcombine.high %v1306_v29, %v1310_v10 }
 0x2d0   :  { %2966 = vmatpush1.bf16.msra.mxu0 %v4007_v24  ;;  %v4063_v24 = vcombine.low %v1305_v8, %v1309_v9  ;;  %v1365_v8 = vld [vmem:[#allocation10 + $0x4b0] sm:$0xff] }
 0x2d1   :  { %3048 = vmatpush1.bf16.msra.mxu1 %v4009_v5  ;;  %2967 = vmatprep.subr.bf16.mxu0 %v4016_v26  ;;  %v4065_v5 = vcombine.low %v1306_v29, %v1310_v10  ;;  %v4072_v26 = vcombine.high %v1313_v19, %v1317_v20  ;;  %v1362_v29 = vld [vmem:[#allocation10 + $0x498] sm:$0xff] }
 0x2d2   :  { %3049 = vmatprep.subr.bf16.mxu1 %v4018_v27  ;;  %v4074_v27 = vcombine.high %v1314_v21, %v1318_v23  ;;  %v1366_v10 = vld [vmem:[#allocation10 + $0x4b8] sm:$0xff] }
 0x2d4   :  { %2968 = vmatpush1.bf16.msra.mxu0 %v4015_v34  ;;  %v4071_v34 = vcombine.low %v1313_v19, %v1317_v20  ;;  %v1369_v19 = vld [vmem:[#allocation10 + $0x4d0] sm:$0xff] }
 0x2d5   :  { %3050 = vmatpush1.bf16.msra.mxu1 %v4017_v35  ;;  %2969 = vmatprep.subr.bf16.mxu0 %v4024_v16  ;;  %v4073_v35 = vcombine.low %v1314_v21, %v1318_v23  ;;  %v4080_v16 = vcombine.high %v1321_v28, %v1325_v31  ;;  %v1373_v20 = vld [vmem:[#allocation10 + $0x4f0] sm:$0xff]  ;;  %v1370_v21 = vld [vmem:[#allocation10 + $0x4d8] sm:$0xff] }
 0x2d6   :  { %3051 = vmatprep.subr.bf16.mxu1 %v4026_v37  ;;  %v4082_v37 = vcombine.high %v1322_v32, %v1326_v33  ;;  %v1374_v23 = vld [vmem:[#allocation10 + $0x4f8] sm:$0xff] }
 0x2d8   :  { %2970 = vmatpush1.bf16.msra.mxu0 %v4023_v41  ;;  %v4079_v41 = vcombine.low %v1321_v28, %v1325_v31  ;;  %v1381_v28 = vld [vmem:[#allocation10 + $0x530] sm:$0xff]  ;;  %v1378_v31 = vld [vmem:[#allocation10 + $0x518] sm:$0xff] }
 0x2d9   :  { %3052 = vmatpush1.bf16.msra.mxu1 %v4025_v42  ;;  %2971 = vmatprep.subr.bf16.mxu0 %v4032_v43  ;;  %v4081_v42 = vcombine.low %v1322_v32, %v1326_v33  ;;  %v4088_v43 = vcombine.high %v1329_v38, %v1333_v25  ;;  %v1382_v32 = vld [vmem:[#allocation10 + $0x538] sm:$0xff]  ;;  %v4129_v33 = vcombine.low %v1370_v21, %v1374_v23 }
 0x2da   :  { %3053 = vmatprep.subr.bf16.mxu1 %v4034_v44  ;;  %v4090_v44 = vcombine.high %v1330_v39, %v1334_v40 }
 0x2dc   :  { %2972 = vmatpush1.bf16.msra.mxu0 %v4031_v49  ;;  %v4087_v49 = vcombine.low %v1329_v38, %v1333_v25  ;;  %v1386_v38 = vld [vmem:[#allocation10 + $0x558] sm:$0xff] }
 0x2dd   :  { %3054 = vmatpush1.bf16.msra.mxu1 %v4033_v51  ;;  %2973 = vmatprep.subr.bf16.mxu0 %v4040_v52  ;;  %v4089_v51 = vcombine.low %v1330_v39, %v1334_v40  ;;  %v4096_v52 = vcombine.high %v1337_v45, %v1341_v46  ;;  %v1390_v25 = vld [vmem:[#allocation10 + $0x578] sm:$0xff]  ;;  %v4137_v40 = vcombine.low %v1378_v31, %v1382_v32 }
 0x2de   :  { %3055 = vmatprep.subr.bf16.mxu1 %v4042_v53  ;;  %v4098_v53 = vcombine.high %v1338_v47, %v1342_v48 }
 0x2e0   :  { %2974 = vmatpush1.bf16.msra.mxu0 %v4039_v58  ;;  %v4095_v58 = vcombine.low %v1337_v45, %v1341_v46  ;;  %v1394_v45 = vld [vmem:[#allocation10 + $0x598] sm:$0xff] }
 0x2e1   :  { %3056 = vmatpush1.bf16.msra.mxu1 %v4041_v59  ;;  %2975 = vmatprep.subr.bf16.mxu0 %v4048_v60  ;;  %v4097_v59 = vcombine.low %v1338_v47, %v1342_v48  ;;  %v4104_v60 = vcombine.high %v1345_v54, %v1349_v55  ;;  %v1398_v46 = vld [vmem:[#allocation10 + $0x5b8] sm:$0xff]  ;;  %v4145_v48 = vcombine.low %v1386_v38, %v1390_v25 }
 0x2e2   :  { %3057 = vmatprep.subr.bf16.mxu1 %v4050_v61  ;;  %v4106_v61 = vcombine.high %v1346_v56, %v1350_v57  ;;  %v1402_v54 = vld [vmem:[#allocation10 + $0x5d8] sm:$0xff] }
 0x2e3   :  { %v1406_v55 = vld [vmem:[#allocation10 + $0x5f8] sm:$0xff] }
 0x2e4   :  { %2976 = vmatpush1.bf16.msra.mxu0 %v4047_v3  ;;  %v1358_v3 = vld [vmem:[#allocation10 + $0x478] sm:$0xff] }
 0x2e5   :  { %3058 = vmatpush1.bf16.msra.mxu1 %v4049_v4  ;;  %2977 = vmatprep.subr.bf16.mxu0 %v4056_v6  ;;  %v4105_v4 = vcombine.low %v1346_v56, %v1350_v57  ;;  %v4112_v6 = vcombine.high %v1353_v62, %v1357_v63  ;;  %v4114_v9 = vcombine.high %v1354_v2, %v1358_v3 }
 0x2e6   :  { %3059 = vmatprep.subr.bf16.mxu1 %v4058_v7  ;;  %v1361_v7 = vld [vmem:[#allocation10 + $0x490] sm:$0xff]  ;;  %v4153_v57 = vcombine.low %v1394_v45, %v1398_v46 }
 0x2e8   :  { %2978 = vmatpush1.bf16.msra.mxu0 %v4055_v11  ;;  %v4111_v11 = vcombine.low %v1353_v62, %v1357_v63  ;;  %v1410_v62 = vld [vmem:[#allocation10 + $0x618] sm:$0xff] }
 0x2e9   :  { %3060 = vmatpush1.bf16.msra.mxu1 %v4057_v0  ;;  %2979 = vmatprep.subr.bf16.mxu0 %v4064_v12  ;;  %v4113_v0 = vcombine.low %v1354_v2, %v1358_v3  ;;  %v4120_v12 = vcombine.high %v1361_v7, %v1365_v8  ;;  %v1414_v63 = vld [vmem:[#allocation10 + $0x638] sm:$0xff]  ;;  %v4161_v2 = vcombine.low %v1402_v54, %v1406_v55 }
 0x2ea   :  { %3061 = vmatprep.subr.bf16.mxu1 %v4066_v13  ;;  %v4122_v13 = vcombine.high %v1362_v29, %v1366_v10 }
 0x2ec   :  { %2980 = vmatpush1.bf16.msra.mxu0 %v4063_v24  ;;  %v4119_v24 = vcombine.low %v1361_v7, %v1365_v8  ;;  %v1421_v7 = vld [vmem:[#allocation10 + $0x670] sm:$0xff]  ;;  %v1418_v8 = vld [vmem:[#allocation10 + $0x658] sm:$0xff] }
 0x2ed   :  { %3062 = vmatpush1.bf16.msra.mxu1 %v4065_v5  ;;  %2981 = vmatprep.subr.bf16.mxu0 %v4072_v26  ;;  %v4128_v5 = vcombine.high %v1369_v19, %v1373_v20  ;;  %v4130_v26 = vcombine.high %v1370_v21, %v1374_v23 }
 0x2ee   :  { %3063 = vmatprep.subr.bf16.mxu1 %v4074_v27  ;;  %v1377_v27 = vld [vmem:[#allocation10 + $0x510] sm:$0xff] }
 0x2ef   :  { %v4135_v39 = vcombine.low %v1377_v27, %v1381_v28 }
 0x2f0   :  { %2982 = vmatpush1.bf16.msra.mxu0 %v4071_v34  ;;  %v4136_v34 = vcombine.high %v1377_v27, %v1381_v28  ;;  %v1434_v27 = vld [vmem:[#allocation10 + $0x6d8] sm:$0xff] }
 0x2f1   :  { %3064 = vmatpush1.bf16.msra.mxu1 %v4073_v35  ;;  %2983 = vmatprep.subr.bf16.mxu0 %v4080_v16  ;;  %v4138_v35 = vcombine.high %v1378_v31, %v1382_v32  ;;  %v1385_v16 = vld [vmem:[#allocation10 + $0x550] sm:$0xff]  ;;  %v1438_v28 = vld [vmem:[#allocation10 + $0x6f8] sm:$0xff] }
 0x2f2   :  { %3065 = vmatprep.subr.bf16.mxu1 %v4082_v37  ;;  %v1389_v37 = vld [vmem:[#allocation10 + $0x570] sm:$0xff] }
 0x2f3   :  { %v4143_v47 = vcombine.low %v1385_v16, %v1389_v37 }
 0x2f4   :  { %2984 = vmatpush1.bf16.msra.mxu0 %v4079_v41  ;;  %v4144_v41 = vcombine.high %v1385_v16, %v1389_v37  ;;  %v1442_v16 = vld [vmem:[#allocation10 + $0x718] sm:$0xff] }
 0x2f5   :  { %3066 = vmatpush1.bf16.msra.mxu1 %v4081_v42  ;;  %2985 = vmatprep.subr.bf16.mxu0 %v4088_v43  ;;  %v4146_v42 = vcombine.high %v1386_v38, %v1390_v25  ;;  %v1393_v43 = vld [vmem:[#allocation10 + $0x590] sm:$0xff]  ;;  %v1446_v37 = vld [vmem:[#allocation10 + $0x738] sm:$0xff]  ;;  %v4193_v25 = vcombine.low %v1434_v27, %v1438_v28 }
 0x2f6   :  { %3067 = vmatprep.subr.bf16.mxu1 %v4090_v44  ;;  %v1397_v44 = vld [vmem:[#allocation10 + $0x5b0] sm:$0xff] }
 0x2f7   :  { %v4151_v56 = vcombine.low %v1393_v43, %v1397_v44 }
 0x2f8   :  { %2986 = vmatpush1.bf16.msra.mxu0 %v4087_v49  ;;  %v4152_v49 = vcombine.high %v1393_v43, %v1397_v44  ;;  %v1450_v43 = vld [vmem:[#allocation10 + $0x758] sm:$0xff] }
 0x2f9   :  { %3068 = vmatpush1.bf16.msra.mxu1 %v4089_v51  ;;  %2987 = vmatprep.subr.bf16.mxu0 %v4096_v52  ;;  %v4154_v51 = vcombine.high %v1394_v45, %v1398_v46  ;;  %v1401_v52 = vld [vmem:[#allocation10 + $0x5d0] sm:$0xff]  ;;  %v1454_v44 = vld [vmem:[#allocation10 + $0x778] sm:$0xff]  ;;  %v4201_v46 = vcombine.low %v1442_v16, %v1446_v37 }
 0x2fa   :  { %3069 = vmatprep.subr.bf16.mxu1 %v4098_v53  ;;  %v1405_v53 = vld [vmem:[#allocation10 + $0x5f0] sm:$0xff] }
 0x2fc   :  { %2988 = vmatpush1.bf16.msra.mxu0 %v4095_v58  ;;  %v4160_v58 = vcombine.high %v1401_v52, %v1405_v53 }
 0x2fd   :  { %3070 = vmatpush1.bf16.msra.mxu1 %v4097_v59  ;;  %2998 = vmatprep.subr.bf16.mxu0 %v4104_v60  ;;  %v4162_v59 = vcombine.high %v1402_v54, %v1406_v55  ;;  %v1409_v60 = vld [vmem:[#allocation10 + $0x610] sm:$0xff]  ;;  %v4209_v55 = vcombine.low %v1450_v43, %v1454_v44 }
 0x2fe   :  { %3080 = vmatprep.subr.bf16.mxu1 %v4106_v61  ;;  %v1413_v61 = vld [vmem:[#allocation10 + $0x630] sm:$0xff] }
 0x2ff   :  { %2990 = vmatmul.mubr.bf16.vlgmr.msra.gmra.mrb[12].mxu0 %v5071_v30  ;;  %v4168_v3 = vcombine.high %v1409_v60, %v1413_v61 }
 0x300   :  { %3072 = vmatmul.mubr.bf16.vlgmr.msra.gmra.mrb[12].mxu1 %v5071_v30  ;;  %2999 = vmatpush1.bf16.msra.mxu0 %v4103_v1  ;;  %v4121_v30 = vcombine.low %v1362_v29, %v1366_v10  ;;  %v4159_v1 = vcombine.low %v1401_v52, %v1405_v53  ;;  %v4167_v29 = vcombine.low %v1409_v60, %v1413_v61  ;;  %v1458_v52 = vld [vmem:[#allocation10 + $0x798] sm:$0xff] }
 0x301   :  { %3030 = vmatprep.mubr.bf16.mxu0 %v5075_v36  ;;  %3081 = vmatpush1.bf16.msra.mxu1 %v4105_v4  ;;  %v4170_v4 = vcombine.high %v1410_v62, %v1414_v63  ;;  %v4169_v10 = vcombine.low %v1410_v62, %v1414_v63  ;;  %v1462_v53 = vld [vmem:[#allocation10 + $0x7b8] sm:$0xff] }
 0x302   :  { %3112 = vmatprep.mubr.bf16.mxu1 %v5075_v36  ;;  %3000 = vmatprep.subr.bf16.mxu0 %v4112_v6  ;;  %v4127_v36 = vcombine.low %v1369_v19, %v1373_v20  ;;  %v1417_v6 = vld [vmem:[#allocation10 + $0x650] sm:$0xff]  ;;  %v1426_v19 = vld [vmem:[#allocation10 + $0x698] sm:$0xff]  ;;  %v4217_v63 = vcombine.low %v1458_v52, %v1462_v53 }
 0x303   :  { %3082 = vmatprep.subr.bf16.mxu1 %v4114_v9  ;;  %v1422_v9 = vld [vmem:[#allocation10 + $0x678] sm:$0xff]  ;;  %v4175_v21 = vcombine.low %v1417_v6, %v1421_v7 }
 0x304   :  { %3001 = vmatpush1.bf16.msra.mxu0 %v4111_v11  ;;  %v4176_v11 = vcombine.high %v1417_v6, %v1421_v7  ;;  %v1430_v20 = vld [vmem:[#allocation10 + $0x6b8] sm:$0xff]  ;;  %v4177_v23 = vcombine.low %v1418_v8, %v1422_v9  ;;  %v4626_v6 = vld [vmem:[#allocation11 + $0x40] sm:$0xff]  }
 0x305   :  { %3083 = vmatpush1.bf16.msra.mxu1 %v4113_v0  ;;  %3002 = vmatprep.subr.bf16.mxu0 %v4120_v12  ;;  %v4178_v0 = vcombine.high %v1418_v8, %v1422_v9  ;;  %v1425_v12 = vld [vmem:[#allocation10 + $0x690] sm:$0xff]  ;;  %v4185_v32 = vcombine.low %v1426_v19, %v1430_v20  ;;  %v1466_v60 = vld [vmem:[#allocation10 + $0x7d8] sm:$0xff]  ;;  %v4627_v7 = vld [vmem:[#allocation11 + $0xc0] sm:$0xff]  }
 0x306   :  { %3084 = vmatprep.subr.bf16.mxu1 %v4122_v13  ;;  %v1429_v13 = vld [vmem:[#allocation10 + $0x6b0] sm:$0xff]  ;;  %v1470_v61 = vld [vmem:[#allocation10 + $0x7f8] sm:$0xff]  ;;  %v4628_v8 = vld [vmem:[#allocation11] sm:$0xff]  }
 0x307   :  { %v4183_v31 = vcombine.low %v1425_v12, %v1429_v13  ;;  %v4629_v9 = vld [vmem:[#allocation11 + $0x80] sm:$0xff]  }
 0x308   :  { %3003 = vmatpush1.bf16.msra.mxu0 %v4119_v24  ;;  %v4184_v24 = vcombine.high %v1425_v12, %v1429_v13  ;;  %v4634_v12 = vld [vmem:[#allocation11 + $0x50] sm:$0xff]  }
 0x309   :  { %3085 = vmatpush1.bf16.msra.mxu1 %v4121_v30  ;;  %3004 = vmatprep.subr.bf16.mxu0 %v4128_v5  ;;  %v4186_v30 = vcombine.high %v1426_v19, %v1430_v20  ;;  %v1433_v5 = vld [vmem:[#allocation10 + $0x6d0] sm:$0xff] }
 0x30a   :  { %3086 = vmatprep.subr.bf16.mxu1 %v4130_v26  ;;  %v1437_v26 = vld [vmem:[#allocation10 + $0x6f0] sm:$0xff] }
 0x30b   :  { %v4191_v38 = vcombine.low %v1433_v5, %v1437_v26  ;;  %v4635_v13 = vld [vmem:[#allocation11 + $0xd0] sm:$0xff]  }
 0x30c   :  { %3005 = vmatpush1.bf16.msra.mxu0 %v4127_v36  ;;  %v4192_v36 = vcombine.high %v1433_v5, %v1437_v26  ;;  %v4636_v19 = vld [vmem:[#allocation11 + $0x10] sm:$0xff]   ;;  %v4643_v5 = vld [vmem:[#allocation11 + $0xe0] sm:$0xff]  }
 0x30d   :  { %3087 = vmatpush1.bf16.msra.mxu1 %v4129_v33  ;;  %3006 = vmatprep.subr.bf16.mxu0 %v4136_v34  ;;  %v4194_v33 = vcombine.high %v1434_v27, %v1438_v28  ;;  %v1441_v34 = vld [vmem:[#allocation10 + $0x710] sm:$0xff]  ;;  %v4644_v26 = vld [vmem:[#allocation11 + $0x20] sm:$0xff]   ;;  %v4646_v28 = vld [vmem:[#allocation11 + $0x68] sm:$0xff]  }
 0x30e   :  { %3088 = vmatprep.subr.bf16.mxu1 %v4138_v35  ;;  %v1445_v35 = vld [vmem:[#allocation10 + $0x730] sm:$0xff]  ;;  %v4645_v27 = vld [vmem:[#allocation11 + $0xa0] sm:$0xff]  }
 0x30f   :  { %v4199_v45 = vcombine.low %v1441_v34, %v1445_v35  ;;  %v4637_v20 = vld [vmem:[#allocation11 + $0x90] sm:$0xff]  }
 0x310   :  { %3007 = vmatpush1.bf16.msra.mxu0 %v4135_v39  ;;  %v4200_v39 = vcombine.high %v1441_v34, %v1445_v35  ;;  %v4651_v34 = vld [vmem:[#allocation11 + $0xf0] sm:$0xff]  }
 0x311   :  { %3089 = vmatpush1.bf16.msra.mxu1 %v4137_v40  ;;  %3008 = vmatprep.subr.bf16.mxu0 %v4144_v41  ;;  %v4202_v40 = vcombine.high %v1442_v16, %v1446_v37  ;;  %v1449_v41 = vld [vmem:[#allocation10 + $0x750] sm:$0xff]  ;;  %v4654_v37 = vld [vmem:[#allocation11 + $0x78] sm:$0xff]  }
 0x312   :  { %3090 = vmatprep.subr.bf16.mxu1 %v4146_v42  ;;  %v1453_v42 = vld [vmem:[#allocation10 + $0x770] sm:$0xff] }
 0x313   :  { %v4207_v54 = vcombine.low %v1449_v41, %v1453_v42  ;;  %v4652_v35 = vld [vmem:[#allocation11 + $0x30] sm:$0xff]  }
 0x314   :  { %3009 = vmatpush1.bf16.msra.mxu0 %v4143_v47  ;;  %v4208_v47 = vcombine.high %v1449_v41, %v1453_v42  ;;  %v4653_v16 = vld [vmem:[#allocation11 + $0xb0] sm:$0xff]   ;;  %v4659_v41 = vld [vmem:[#allocation11 + $0x1c0] sm:$0xff]  }
 0x315   :  { %3091 = vmatpush1.bf16.msra.mxu1 %v4145_v48  ;;  %3010 = vmatprep.subr.bf16.mxu0 %v4152_v49  ;;  %v4210_v48 = vcombine.high %v1450_v43, %v1454_v44  ;;  %v1457_v49 = vld [vmem:[#allocation10 + $0x790] sm:$0xff]  ;;  %v5099_v42 = vld [vmem:[%s5138_s6] sm:$0xff] }
 0x316   :  { %3092 = vmatprep.subr.bf16.mxu1 %v4154_v51  ;;  %v1461_v51 = vld [vmem:[#allocation10 + $0x7b0] sm:$0xff]  ;;  %v1476_v43 = vrot.slane %v5099_v42, %v5032_v15  ;;  %v1484_v44 = vrot.slane %v5099_v42, %v5054_v22 }
 0x317   :  { %v4215_v62 = vcombine.low %v1457_v49, %v1461_v51 }
 0x318   :  { %3011 = vmatpush1.bf16.msra.mxu0 %v4151_v56  ;;  %v4216_v56 = vcombine.high %v1457_v49, %v1461_v51 }
 0x319   :  { %3093 = vmatpush1.bf16.msra.mxu1 %v4153_v57  ;;  %3012 = vmatprep.subr.bf16.mxu0 %v4160_v58  ;;  %v4218_v57 = vcombine.high %v1458_v52, %v1462_v53  ;;  %v1465_v58 = vld [vmem:[#allocation10 + $0x7d0] sm:$0xff] }
 0x31a   :  { %3094 = vmatprep.subr.bf16.mxu1 %v4162_v59  ;;  %v1469_v59 = vld [vmem:[#allocation10 + $0x7f0] sm:$0xff] }
 0x31c   :  { %3013 = vmatpush1.bf16.msra.mxu0 %v4159_v1  ;;  %v4224_v1 = vcombine.high %v1465_v58, %v1469_v59 }
 0x31d   :  { %3095 = vmatpush1.bf16.msra.mxu1 %v4161_v2  ;;  %3014 = vmatprep.subr.bf16.mxu0 %v4168_v3  ;;  %v4226_v2 = vcombine.high %v1466_v60, %v1470_v61  ;;  %v4223_v3 = vcombine.low %v1465_v58, %v1469_v59 }
 0x31e   :  { %3096 = vmatprep.subr.bf16.mxu1 %v4170_v4  ;;  %v4225_v4 = vcombine.low %v1466_v60, %v1470_v61  ;;  %v4660_v61 = vld [vmem:[#allocation11 + $0x100] sm:$0xff]  }
 0x320   :  { %3015 = vmatpush1.bf16.msra.mxu0 %v4167_v29  ;;  %v4630_v29 = vld [vmem:[#allocation11 + $0x48] sm:$0xff]  }
 0x321   :  { %3097 = vmatpush1.bf16.msra.mxu1 %v4169_v10  ;;  %3016 = vmatprep.subr.bf16.mxu0 %v4176_v11  ;;  %v4631_v10 = vld [vmem:[#allocation11 + $0xc8] sm:$0xff]  }
 0x322   :  { %3098 = vmatprep.subr.bf16.mxu1 %v4178_v0  ;;  %v4632_v11 = vld [vmem:[#allocation11 + $0x8] sm:$0xff]  }
 0x323   :  { %v4633_v0 = vld [vmem:[#allocation11 + $0x88] sm:$0xff]  }
 0x324   :  { %3017 = vmatpush1.bf16.msra.mxu0 %v4175_v21  ;;  %v4638_v21 = vld [vmem:[#allocation11 + $0x58] sm:$0xff]  }
 0x325   :  { %3099 = vmatpush1.bf16.msra.mxu1 %v4177_v23  ;;  %3018 = vmatprep.subr.bf16.mxu0 %v4184_v24  ;;  %v4639_v23 = vld [vmem:[#allocation11 + $0xd8] sm:$0xff]  }
 0x326   :  { %3100 = vmatprep.subr.bf16.mxu1 %v4186_v30  ;;  %v4640_v24 = vld [vmem:[#allocation11 + $0x18] sm:$0xff]   ;;  %v4642_v30 = vld [vmem:[#allocation11 + $0x60] sm:$0xff]  }
 0x328   :  { %3019 = vmatpush1.bf16.msra.mxu0 %v4183_v31  ;;  %v4647_v31 = vld [vmem:[#allocation11 + $0xe8] sm:$0xff]  }
 0x329   :  { %3101 = vmatpush1.bf16.msra.mxu1 %v4185_v32  ;;  %3020 = vmatprep.subr.bf16.mxu0 %v4192_v36  ;;  %v4648_v32 = vld [vmem:[#allocation11 + $0x28] sm:$0xff]  }
 0x32a   :  { %3102 = vmatprep.subr.bf16.mxu1 %v4194_v33  ;;  %v4649_v36 = vld [vmem:[#allocation11 + $0xa8] sm:$0xff]   ;;  %v4650_v33 = vld [vmem:[#allocation11 + $0x70] sm:$0xff]  }
 0x32c   :  { %3021 = vmatpush1.bf16.msra.mxu0 %v4191_v38  ;;  %v4655_v38 = vld [vmem:[#allocation11 + $0xf8] sm:$0xff]  }
 0x32d   :  { %3103 = vmatpush1.bf16.msra.mxu1 %v4193_v25  ;;  %3022 = vmatprep.subr.bf16.mxu0 %v4200_v39  ;;  %v4656_v25 = vld [vmem:[#allocation11 + $0x38] sm:$0xff]  }
 0x32e   :  { %3104 = vmatprep.subr.bf16.mxu1 %v4202_v40  ;;  %v4657_v39 = vld [vmem:[#allocation11 + $0xb8] sm:$0xff]   ;;  %v4658_v40 = vld [vmem:[#allocation11 + $0x140] sm:$0xff]  }
 0x330   :  { %3023 = vmatpush1.bf16.msra.mxu0 %v4199_v45  ;;  %v1480_v45 = vrot.slane %v5099_v42, %v5040_v17 }
 0x331   :  { %3105 = vmatpush1.bf16.msra.mxu1 %v4201_v46  ;;  %3024 = vmatprep.subr.bf16.mxu0 %v4208_v47  ;;  %v1488_v46 = vrot.slane %v5099_v42, %v5043_v18 }
 0x332   :  { %3106 = vmatprep.subr.bf16.mxu1 %v4210_v48 }
 0x334   :  { %3025 = vmatpush1.bf16.msra.mxu0 %v4207_v54 }
 0x335   :  { %3107 = vmatpush1.bf16.msra.mxu1 %v4209_v55  ;;  %3026 = vmatprep.subr.bf16.mxu0 %v4216_v56 }
 0x336   :  { %3108 = vmatprep.subr.bf16.mxu1 %v4218_v57 }
 0x338   :  { %3027 = vmatpush1.bf16.msra.mxu0 %v4215_v62 }
 0x339   :  { %3109 = vmatpush1.bf16.msra.mxu1 %v4217_v63  ;;  %3028 = vmatprep.subr.bf16.mxu0 %v4224_v1  ;;  %v4661_v1 = vld [vmem:[#allocation11 + $0x180] sm:$0xff]  }
 0x33a   :  { %3110 = vmatprep.subr.bf16.mxu1 %v4226_v2  ;;  %v4662_v2 = vld [vmem:[#allocation11 + $0x148] sm:$0xff]  }
 0x33c   :  { %3029 = vmatpush1.bf16.msra.mxu0 %v4223_v3 }
 0x33d   :  { %3111 = vmatpush1.bf16.msra.mxu1 %v4225_v4  ;;  %4292 = vmatprep.subr.bf16.mxu0 %v4626_v6  ;;  %v4663_v4 = vld [vmem:[#allocation11 + $0x1c8] sm:$0xff]  }
 0x33e   :  { %4314 = vmatprep.subr.bf16.mxu1 %v4627_v7  ;;  %v4664_v6 = vld [vmem:[#allocation11 + $0x108] sm:$0xff]  }
 0x33f   :  { %3031 = vmatmul.mubr.bf16.vlgmr.msra.gmra.mrb[12].mxu0 %v5084_v50  ;;  %v4665_v7 = vld [vmem:[#allocation11 + $0x188] sm:$0xff]  }
 0x340   :  { %3113 = vmatmul.mubr.bf16.vlgmr.msra.gmra.mrb[12].mxu1 %v5084_v50  ;;  %4293 = vmatpush3.bf16.msra.mxu0 %v4628_v8  ;;  %v4641_v50 = vld [vmem:[#allocation11 + $0x98] sm:$0xff]   ;;  %v4666_v8 = vld [vmem:[#allocation11 + $0x150] sm:$0xff]  }
 0x341   :  { %4315 = vmatpush3.bf16.msra.mxu1 %v4629_v9  ;;  %4294 = vmatprep.subr.bf16.mxu0 %v4630_v29  ;;  %v4667_v9 = vld [vmem:[#allocation11 + $0x1d0] sm:$0xff]  }
 0x342   :  { %4316 = vmatprep.subr.bf16.mxu1 %v4631_v10  ;;  %v4668_v29 = vld [vmem:[#allocation11 + $0x110] sm:$0xff]  }
 0x343   :  { %v4669_v10 = vld [vmem:[#allocation11 + $0x190] sm:$0xff]  }
 0x344   :  { %4295 = vmatpush3.bf16.msra.mxu0 %v4632_v11  ;;  %v4670_v11 = vld [vmem:[#allocation11 + $0x158] sm:$0xff]  }
 0x345   :  { %4317 = vmatpush3.bf16.msra.mxu1 %v4633_v0  ;;  %4296 = vmatprep.subr.bf16.mxu0 %v4634_v12  ;;  %v4671_v0 = vld [vmem:[#allocation11 + $0x1d8] sm:$0xff]  }
 0x346   :  { %4318 = vmatprep.subr.bf16.mxu1 %v4635_v13  ;;  %v4672_v12 = vld [vmem:[#allocation11 + $0x118] sm:$0xff]  }
 0x347   :  { %v4673_v13 = vld [vmem:[#allocation11 + $0x198] sm:$0xff]  }
 0x348   :  { %4297 = vmatpush3.bf16.msra.mxu0 %v4636_v19  ;;  %v4674_v19 = vld [vmem:[#allocation11 + $0x160] sm:$0xff]  }
 0x349   :  { %4319 = vmatpush3.bf16.msra.mxu1 %v4637_v20  ;;  %4298 = vmatprep.subr.bf16.mxu0 %v4638_v21  ;;  %v4675_v20 = vld [vmem:[#allocation11 + $0x1e0] sm:$0xff]  }
 0x34a   :  { %4320 = vmatprep.subr.bf16.mxu1 %v4639_v23  ;;  %v4676_v21 = vld [vmem:[#allocation11 + $0x120] sm:$0xff]  }
 0x34b   :  { %v4677_v23 = vld [vmem:[#allocation11 + $0x1a0] sm:$0xff]  }
 0x34c   :  { %4299 = vmatpush3.bf16.msra.mxu0 %v4640_v24  ;;  %v4678_v24 = vld [vmem:[#allocation11 + $0x168] sm:$0xff]  }
 0x34d   :  { %4321 = vmatpush3.bf16.msra.mxu1 %v4641_v50  ;;  %4300 = vmatprep.subr.bf16.mxu0 %v4642_v30  ;;  %v4679_v50 = vld [vmem:[#allocation11 + $0x1e8] sm:$0xff]  }
 0x34e   :  { %4322 = vmatprep.subr.bf16.mxu1 %v4643_v5  ;;  %v4680_v30 = vld [vmem:[#allocation11 + $0x128] sm:$0xff]  }
 0x34f   :  { %v4681_v5 = vld [vmem:[#allocation11 + $0x1a8] sm:$0xff]  }
 0x350   :  { %4301 = vmatpush3.bf16.msra.mxu0 %v4644_v26  ;;  %v4682_v26 = vld [vmem:[#allocation11 + $0x170] sm:$0xff]  }
 0x351   :  { %4323 = vmatpush3.bf16.msra.mxu1 %v4645_v27  ;;  %4302 = vmatprep.subr.bf16.mxu0 %v4646_v28  ;;  %v4683_v27 = vld [vmem:[#allocation11 + $0x1f0] sm:$0xff]  }
 0x352   :  { %4324 = vmatprep.subr.bf16.mxu1 %v4647_v31  ;;  %v4684_v28 = vld [vmem:[#allocation11 + $0x130] sm:$0xff]  }
 0x353   :  { %v4685_v31 = vld [vmem:[#allocation11 + $0x1b0] sm:$0xff]  }
 0x354   :  { %4303 = vmatpush3.bf16.msra.mxu0 %v4648_v32  ;;  %v4686_v32 = vld [vmem:[#allocation11 + $0x178] sm:$0xff]  }
 0x355   :  { %4325 = vmatpush3.bf16.msra.mxu1 %v4649_v36  ;;  %4304 = vmatprep.subr.bf16.mxu0 %v4650_v33  ;;  %v4687_v36 = vld [vmem:[#allocation11 + $0x1f8] sm:$0xff]  }
 0x356   :  { %4326 = vmatprep.subr.bf16.mxu1 %v4651_v34  ;;  %v4688_v33 = vld [vmem:[#allocation11 + $0x138] sm:$0xff]  }
 0x357   :  { %v4689_v34 = vld [vmem:[#allocation11 + $0x1b8] sm:$0xff]  }
 0x358   :  { %4305 = vmatpush3.bf16.msra.mxu0 %v4652_v35  ;;  %v1491_v35 = vsub.s32 4, %v5029_v14 }
 0x359   :  { %4327 = vmatpush3.bf16.msra.mxu1 %v4653_v16  ;;  %4306 = vmatprep.subr.bf16.mxu0 %v4654_v37  ;;  %v1499_v16 = vsub.s32 6, %v5029_v14  ;;  %v1495_v37 = vsub.s32 5, %v5029_v14 }
 0x35a   :  { %4328 = vmatprep.subr.bf16.mxu1 %v4655_v38  ;;  %v1503_v38 = vsub.s32 7, %v5029_v14 }
 0x35c   :  { %4307 = vmatpush3.bf16.msra.mxu0 %v4656_v25  ;;  %v1492_v25 = vrot.slane %v5099_v42, %v1491_v35 }
 0x35d   :  { %4329 = vmatpush3.bf16.msra.mxu1 %v4657_v39  ;;  %4336 = vmatprep.subr.bf16.mxu0 %v4658_v40  ;;  %v1500_v39 = vrot.slane %v5099_v42, %v1499_v16  ;;  %v1496_v40 = vrot.slane %v5099_v42, %v1495_v37 }
 0x35e   :  { %4358 = vmatprep.subr.bf16.mxu1 %v4659_v41  ;;  %v1504_v41 = vrot.slane %v5099_v42, %v1503_v38 }
 0x392   :  { %v2868_v47 = vpop.f32.mrb[8].mxu0  ;;  %v2950_v48 = vpop.f32.mrb[8].mxu1 }
 0x393   :  { %v4384_v49 = vadd.f32 %v2868_v47, %v1476_v43  ;;  %v4386_v51 = vadd.f32 %v2950_v48, %v1484_v44  ;;  %v2870_v52 = vpop.f32.mrb[9].mxu0  ;;  %v2952_v53 = vpop.f32.mrb[9].mxu1 }
 0x394   :  { %v4385_v54 = vadd.f32 %v2870_v52, %v1480_v45  ;;  %v4387_v55 = vadd.f32 %v2952_v53, %v1488_v46  ;;  %v2872_v56 = vpop.f32.mrb[10].mxu0  ;;  %v2954_v57 = vpop.f32.mrb[10].mxu1 }
 0x395   :  { %4706 = vtanh.f32 %v4384_v49  ;;  %v2873_v15 = vpop.f32.mrb[11].mxu0  ;;  %v2955_v58 = vpop.f32.mrb[11].mxu1 }
 0x396   :  { %4708 = vtanh.f32 %v4386_v51 }
 0x397   :  { %4710 = vtanh.f32 %v4385_v54 }
 0x398   :  { %4712 = vtanh.f32 %v4387_v55 }
 0x39f   :  { %v4707_v17 = vpop.eup %4706 }
 0x3a0   :  { %v4709_v22 = vpop.eup %4708  ;;  %v3129_v62 = vpack.c.bf16 %v4707_v17, %v4707_v17 }
 0x3a1   :  { %v4711_v59 = vpop.eup %4710  ;;  %v3131_v3 = vpack.c.bf16 %v4709_v22, %v4709_v22 }
 0x3a2   :  { %v4713_v18 = vpop.eup %4712  ;;  %v3130_v60 = vpack.c.bf16 %v4711_v59, %v4711_v59 }
 0x3a3   :  { %v3132_v63 = vpack.c.bf16 %v4713_v18, %v4713_v18 }
 0x3a4   :  { %3688 = vmatprep.mubr.bf16.mxu0 %v3130_v60  ;;  %v4227_v60 = vld [vmem:[%s5140_s8] ss:$0 sm:$0xff]  ;;  %s4899_s8 = smov [#allocation13]  }
 0x3a5   :  { %3728 = vmatprep.mubr.bf16.mxu1 %v3132_v63  ;;  %3689 = vmatmul.mubr.bf16.vlgmr.msra.gmra.mrb[16].mxu0 %v3129_v62  ;;  %s3823_s20 = sshll.u32 %s4899_s8, 4  ;;  %s3824_s20 = int_to_ptr.vmem [resolvable:$true] %s3823_s20 }
 0x3a6   :  { %3729 = vmatmul.mubr.bf16.vlgmr.msra.gmra.mrb[16].mxu1 %v3131_v3  ;;  %4337 = vmatpush3.bf16.msra.mxu0 %v4660_v61  ;;  %s4854_s21 = scalar_lea.vmem %s3824_s20, 128  ;;  %p4859_p7 = scmp.lt.s32.totalorder %s3824_s20, %s3824_s20 }
 0x3a7   :  { %4359 = vmatpush3.bf16.msra.mxu1 %v4661_v1  ;;  %4338 = vmatprep.subr.bf16.mxu0 %v4662_v2  ;;  %p4855_p6 = scmp.ne.s32.totalorder %s3824_s20, %s4854_s21  ;;  %p4860_p8 = scmp.lt.s32.totalorder %s4854_s21, %s4854_s21 }
 0x3a8   :  { %4360 = vmatprep.subr.bf16.mxu1 %v4663_v4 }
 0x3a9   :  { %p4861_p9 = por %p4860_p8, %p4859_p7 }
 0x3aa   :  { %4339 = vmatpush3.bf16.msra.mxu0 %v4664_v6 }
 0x3ab   :  { %4361 = vmatpush3.bf16.msra.mxu1 %v4665_v7  ;;  %4340 = vmatprep.subr.bf16.mxu0 %v4666_v8  ;;  %p4862_p10 = pnand %p4861_p9, %p4855_p6 }
 0x3ac   :  { %4362 = vmatprep.subr.bf16.mxu1 %v4667_v9 }
 0x3ae   :  { %4341 = vmatpush3.bf16.msra.mxu0 %v4668_v29 }
 0x3af   :  { %4363 = vmatpush3.bf16.msra.mxu1 %v4669_v10  ;;  %4342 = vmatprep.subr.bf16.mxu0 %v4670_v11 }
 0x3b0   :  { %4364 = vmatprep.subr.bf16.mxu1 %v4671_v0 }
 0x3b2   :  { %4343 = vmatpush3.bf16.msra.mxu0 %v4672_v12 }
 0x3b3   :  { %4365 = vmatpush3.bf16.msra.mxu1 %v4673_v13  ;;  %4344 = vmatprep.subr.bf16.mxu0 %v4674_v19 }
 0x3b4   :  { %4366 = vmatprep.subr.bf16.mxu1 %v4675_v20 }
 0x3b6   :  { %4345 = vmatpush3.bf16.msra.mxu0 %v4676_v21 }
 0x3b7   :  { %4367 = vmatpush3.bf16.msra.mxu1 %v4677_v23  ;;  %4346 = vmatprep.subr.bf16.mxu0 %v4678_v24 }
 0x3b8   :  { %4368 = vmatprep.subr.bf16.mxu1 %v4679_v50 }
 0x3ba   :  { %4347 = vmatpush3.bf16.msra.mxu0 %v4680_v30 }
 0x3bb   :  { %4369 = vmatpush3.bf16.msra.mxu1 %v4681_v5  ;;  %4348 = vmatprep.subr.bf16.mxu0 %v4682_v26 }
 0x3bc   :  { %4370 = vmatprep.subr.bf16.mxu1 %v4683_v27 }
 0x3be   :  { %4349 = vmatpush3.bf16.msra.mxu0 %v4684_v28 }
 0x3bf   :  { %4371 = vmatpush3.bf16.msra.mxu1 %v4685_v31  ;;  %4350 = vmatprep.subr.bf16.mxu0 %v4686_v32 }
 0x3c0   :  { %4372 = vmatprep.subr.bf16.mxu1 %v4687_v36 }
 0x3c2   :  { %4351 = vmatpush3.bf16.msra.mxu0 %v4688_v33 }
 0x3c3   :  { %4373 = vmatpush3.bf16.msra.mxu1 %v4689_v34 }
 0x412   :  { %v3032_v43 = vpop.f32.mrb[12].mxu0 }
 0x413   :  { %v4388_v44 = vadd.f32 %v3032_v43, %v1492_v25  ;;  %v3114_v45 = vpop.f32.mrb[12].mxu1  ;;  %v3034_v46 = vpop.f32.mrb[13].mxu0 }
 0x414   :  { %v4390_v47 = vadd.f32 %v3114_v45, %v1500_v39  ;;  %v4389_v48 = vadd.f32 %v3034_v46, %v1496_v40  ;;  %v3116_v49 = vpop.f32.mrb[13].mxu1  ;;  %v3036_v51 = vpop.f32.mrb[14].mxu0 }
 0x415   :  { %4714 = vtanh.f32 %v4388_v44  ;;  %v4391_v52 = vadd.f32 %v3116_v49, %v1504_v41  ;;  %v3118_v53 = vpop.f32.mrb[14].mxu1  ;;  %v3037_v14 = vpop.f32.mrb[15].mxu0 }
 0x416   :  { %4716 = vtanh.f32 %v4390_v47  ;;  %v3119_v54 = vpop.f32.mrb[15].mxu1 }
 0x417   :  { %4718 = vtanh.f32 %v4389_v48 }
 0x418   :  { %4720 = vtanh.f32 %v4391_v52 }
 0x41f   :  { %v4715_v55 = vpop.eup %4714 }
 0x420   :  { %v4717_v56 = vpop.eup %4716  ;;  %v3133_v58 = vpack.c.bf16 %v4715_v55, %v4715_v55 }
 0x421   :  { %v4719_v57 = vpop.eup %4718  ;;  %v3135_v22 = vpack.c.bf16 %v4717_v56, %v4717_v56 }
 0x422   :  { %v4721_v42 = vpop.eup %4720  ;;  %v3134_v15 = vpack.c.bf16 %v4719_v57, %v4719_v57 }
 0x423   :  { %v3136_v17 = vpack.c.bf16 %v4721_v42, %v4721_v42 }
 0x424   :  { %3768 = vmatprep.mubr.bf16.mxu0 %v3134_v15 }
 0x425   :  { %3808 = vmatprep.mubr.bf16.mxu1 %v3136_v17  ;;  %3769 = vmatmul.mubr.bf16.vlgmr.msra.gmra.mrb[20].mxu0 %v3133_v58 }
 0x426   :  { %3809 = vmatmul.mubr.bf16.vlgmr.msra.gmra.mrb[20].mxu1 %v3135_v22 }
 0x478   :  { %v4308_v59 = vpop.f32.mrb[16].mxu0 }
 0x479   :  { %v4330_v18 = vpop.f32.mrb[16].mxu1  ;;  %v4309_v61 = vpop.f32.mrb[17].mxu0 }
 0x47a   :  { %v4310_v62 = vadd.f32 %v4309_v61, %v4308_v59  ;;  %v4331_v63 = vpop.f32.mrb[17].mxu1  ;;  %v4311_v1 = vpop.f32.mrb[18].mxu0 }
 0x47b   :  { %v4332_v2 = vadd.f32 %v4331_v63, %v4330_v18  ;;  %v4333_v3 = vpop.f32.mrb[18].mxu1  ;;  %v4312_v4 = vpop.f32.mrb[19].mxu0 }
 0x47c   :  { %v3691_v6 = vadd.f32 %v4310_v62, %v4227_v60  ;;  %v4334_v7 = vpop.f32.mrb[19].mxu1 }
 0x47e   :  { %v3731_v8 = vadd.f32 %v4332_v2, %v3691_v6 }
 0x4f8   :  { %v4352_v9 = vpop.f32.mrb[20].mxu0 }
 0x4f9   :  { %v4374_v29 = vpop.f32.mrb[20].mxu1  ;;  %v4353_v10 = vpop.f32.mrb[21].mxu0 }
 0x4fa   :  { %v4354_v11 = vadd.f32 %v4353_v10, %v4352_v9  ;;  %v4375_v0 = vpop.f32.mrb[21].mxu1  ;;  %v4355_v12 = vpop.f32.mrb[22].mxu0 }
 0x4fb   :  { %v4376_v13 = vadd.f32 %v4375_v0, %v4374_v29  ;;  %v4377_v19 = vpop.f32.mrb[22].mxu1  ;;  %v4356_v20 = vpop.f32.mrb[23].mxu0 }
 0x4fc   :  { %v3771_v21 = vadd.f32 %v4354_v11, %v3731_v8  ;;  %v4378_v23 = vpop.f32.mrb[23].mxu1 }
 0x4fe   :  { %v3811_v24 = vadd.f32 %v4376_v13, %v3771_v21 }
 0x500   :  { %3816 = vst [vmem:[#allocation13] sm:$0xff] %v3811_v24 }
 0x501   :  { %4865 = shalt.err (!%p4862_p10)
}
 0x502   :  { %s4866_s12 = scalar_lea.hbm %s5141_s9, 128 }
 0x503   :  { %p4867_p11 = scmp.ne.s32.totalorder %s5141_s9, %s4866_s12  ;;  %p4870_p12 = scmp.lt.u32.totalorder %s4866_s12, %s5141_s9 }
 0x505   :  { %p4872_p13 = pnand %p4870_p12, %p4867_p11 }
 0x507   :  { %4875 = shalt.err (!%p4872_p13)
}
 0x508   :  { %3826 = dma.vmem_to_hbm [thread:$0]  %s3824_s20, 128, %s5141_s9, [#allocation4]  }
 0x509   :  { %4884 = dma.done.wait [#allocation4], 128  }
 0x50a   :  { %4885 = vsyncadd [#allocation4], 4294967168 }
 0x50b   :  { %3830 = vsyncpa [#allocation3], 1 }
 0x50c   :  { %3831 = vsyncpa [#allocation6], 1 }
 0x50d   :  { %3832 = vsyncpa [#allocation9], 1 }
 0x50e   :  { %3833 = vsyncpa [#allocation12], 1 }
 0x50f   :  { %3834 = vsyncpa [#allocation4], 1 }

</bundles_post_ra>
